<compile_context>
chip_gen: v5e
topology: v5e:2x2
jax: 0.10.0
libtpu: 0.0.40
codegen_flags: <defaults>
</compile_context>

<pallas_src>
import math

import jax
import jax.numpy as jnp
from jax import lax
from jax.experimental import pallas as pl
from jax.experimental.pallas import tpu as pltpu

# ---------------- small synthetic ViT config ----------------
BATCH = 2
IN_CH = 4
IMAGE = 16
PATCH = 8
GH = GW = IMAGE // PATCH            # 2 x 2 grid of patches
NUM_PATCHES = GH * GW               # 4
SEQ = NUM_PATCHES + 1               # +1 class token -> 5
SEQ_PAD = 8                         # pad to a full sublane group
ROWS = BATCH * SEQ_PAD              # 16 rows processed in one shot
DIM = 32
FF_DIM = 64
NUM_HEADS = 4
HEAD_DIM = DIM // NUM_HEADS         # 8
NUM_LAYERS = 2
PATCH_DIM = IN_CH * PATCH * PATCH   # 256
LN_EPS = 1e-6                       # nn.LayerNorm(dim, eps=1e-6)
INV_SQRT_HD = 1.0 / math.sqrt(HEAD_DIM)
NEG_INF = -1e30
OUT_LANES = 128                     # lane-dense output slab width

LAYER_KEYS = ["wqkv", "bqkv", "wo", "bo",
              "g1", "be1", "w1", "bf1",
              "w2", "bf2", "g2", "be2"]


# ---------------- fused Pallas kernel ----------------
def vit_kernel(p_ref, wp_ref, bp_ref, cls_ref, pos_ref,
               wqkv_ref, bqkv_ref, wo_ref, bo_ref,
               g1_ref, be1_ref, w1_ref, bf1_ref,
               w2_ref, bf2_ref, g2_ref, be2_ref,
               ng_ref, nb_ref, o_ref):
    f32 = jnp.float32

    def layer_norm(v, g, b):
        # two-pass form kept on purpose (numerically safe; see review).
        u = jnp.mean(v, axis=-1, keepdims=True)
        c = v - u
        s = jnp.mean(c * c, axis=-1, keepdims=True)
        return c * lax.rsqrt(s + LN_EPS) * g + b

    # ---- patch embedding: Conv2d(kernel=stride=PATCH) as one matmul ----
    emb = jnp.dot(p_ref[...], wp_ref[...],
                  preferred_element_type=f32) + bp_ref[...]      # (B*NP, DIM)
    emb = emb.reshape(BATCH, NUM_PATCHES, DIM)

    # ---- [cls] token cat + PositionalEmbedding1D + pad to SEQ_PAD rows ----
    cls = cls_ref[...] + pos_ref[0:1, :]                         # (1, DIM)
    emb = emb + pos_ref[1:SEQ, :][None]                          # (B, NP, DIM)
    x = jnp.concatenate(
        [jnp.broadcast_to(cls[None], (BATCH, 1, DIM)),
         emb,
         jnp.zeros((BATCH, SEQ_PAD - SEQ, DIM), f32)],
        axis=1)                                                  # (B, SEQ_PAD, DIM)
    x = x.reshape(ROWS, DIM)

    # pad key columns never receive attention weight (hoisted out of loops)
    kmask = lax.broadcasted_iota(jnp.int32, (1, SEQ_PAD, SEQ_PAD), 2) < SEQ

    for l in range(NUM_LAYERS):
        # --- multi-head self-attention (pre-norm), fused QKV projection ---
        h = layer_norm(x, g1_ref[l], be1_ref[l])
        qkv = jnp.dot(h, wqkv_ref[l],
                      preferred_element_type=f32) + bqkv_ref[l]  # (ROWS, 3*DIM)
        qkv3 = qkv.reshape(BATCH, SEQ_PAD, 3 * DIM)

        # Fold heads into the leading batch axis (head-major), so a single
        # batched einsum / softmax handles all heads at once.
        qs, ks, vs = [], [], []
        for hh in range(NUM_HEADS):
            lo = hh * HEAD_DIM
            qs.append(qkv3[:, :, lo:lo + HEAD_DIM])
            ks.append(qkv3[:, :, DIM + lo:DIM + lo + HEAD_DIM])
            vs.append(qkv3[:, :, 2 * DIM + lo:2 * DIM + lo + HEAD_DIM])
        q = jnp.concatenate(qs, axis=0)                          # (B*H, S, HD)
        k = jnp.concatenate(ks, axis=0)
        v = jnp.concatenate(vs, axis=0)

        s = jnp.einsum('bqd,bkd->bqk', q, k,
                       preferred_element_type=f32) * INV_SQRT_HD  # (B*H, S, S)
        s = jnp.where(kmask, s, NEG_INF)
        s = s - jnp.max(s, axis=-1, keepdims=True)
        p = jnp.exp(s)
        p = p * pl.reciprocal(jnp.sum(p, axis=-1, keepdims=True),
                              approx=True)                       # EUP vrcp
        ctx = jnp.einsum('bqk,bkd->bqd', p, v,
                         preferred_element_type=f32)             # (B*H, S, HD)

        # merge heads back into lanes (head 0 first == torch head concat) and
        # do ONE output projection (single MXU push with K=DIM).
        ctx_full = jnp.concatenate(
            [ctx[hh * BATCH:(hh + 1) * BATCH] for hh in range(NUM_HEADS)],
            axis=-1)                                             # (B, S, DIM)
        attn_out = jnp.dot(ctx_full.reshape(ROWS, DIM), wo_ref[l],
                           preferred_element_type=f32)
        x = x + attn_out + bo_ref[l]                             # dropout == id

        # --- position-wise feed-forward (pre-norm), exact GELU ---
        h2 = layer_norm(x, g2_ref[l], be2_ref[l])
        f = jnp.dot(h2, w1_ref[l], preferred_element_type=f32) + bf1_ref[l]
        f = 0.5 * f * (1.0 + lax.erf(f * (1.0 / math.sqrt(2.0))))
        x = x + (jnp.dot(f, w2_ref[l], preferred_element_type=f32)
                 + bf2_ref[l])                                   # dropout == id

    # final nn.LayerNorm(dim, eps=1e-6)
    y = layer_norm(x, ng_ref[...], nb_ref[...])                  # (ROWS, DIM)

    # lane-dense store: full-128-lane slab (data in lanes [0, DIM), rest 0)
    # -> unmasked vst instead of masked 32-lane partial stores.
    o_ref[...] = jnp.concatenate(
        [y, jnp.zeros((ROWS, OUT_LANES - DIM), f32)], axis=-1)


# ---------------- wrapper ----------------
def vit_forward(x_nchw, params):
    B, C, H, W = x_nchw.shape
    assert B == BATCH and C == IN_CH and H == IMAGE and W == IMAGE

    # im2col for a stride==kernel conv (pure layout glue)
    p = x_nchw.reshape(B, C, GH, PATCH, GW, PATCH)
    p = p.transpose(0, 2, 4, 1, 3, 5).reshape(B * NUM_PATCHES, PATCH_DIM)

    vmem = pl.BlockSpec(memory_space=pltpu.MemorySpace.VMEM)
    args = ([p, params["w_patch"], params["b_patch"],
             params["cls_token"], params["pos_emb"]]
            + [params[k] for k in LAYER_KEYS]
            + [params["norm_g"], params["norm_b"]])

    out_slab = pl.pallas_call(
        vit_kernel,
        out_shape=jax.ShapeDtypeStruct((ROWS, OUT_LANES), jnp.float32),
        in_specs=[vmem] * len(args),
        out_specs=vmem,
    )(*args)

    # strip lane padding, then the 3 pad rows per batch element
    out = out_slab[:, :DIM].reshape(BATCH, SEQ_PAD, DIM)[:, :SEQ, :]

    # ViT.forward returns (x, mask, lengths); fc / pre_logits are never applied.
    return out, None, None


# ---------------- deterministic parameter init ----------------
def init_params(key):
    keys = iter(jax.random.split(key, 64))

    def xavier(shape, fan_in, fan_out):
        bound = math.sqrt(6.0 / (fan_in + fan_out))
        return jax.random.uniform(next(keys), shape, jnp.float32, -bound, bound)

    def bias(shape):
        return 1e-6 * jax.random.normal(next(keys), shape, jnp.float32)

    params = {}
    # patch_embedding: Conv2d(C, D, kernel=stride=PATCH) stored as (P, D)
    params["w_patch"] = xavier((PATCH_DIM, DIM), PATCH_DIM, DIM)
    params["b_patch"] = bias((1, DIM))
    params["cls_token"] = jnp.zeros((1, DIM), jnp.float32)          # init to 0
    params["pos_emb"] = 0.02 * jax.random.normal(next(keys), (SEQ, DIM),
                                                 jnp.float32)

    # fused QKV: init Wq/Wk/Wv separately (preserves per-matrix xavier stats),
    # then concatenate on the output axis ([q | k | v] column blocks).
    wq = xavier((NUM_LAYERS, DIM, DIM), DIM, DIM)
    wk = xavier((NUM_LAYERS, DIM, DIM), DIM, DIM)
    wv = xavier((NUM_LAYERS, DIM, DIM), DIM, DIM)
    params["wqkv"] = jnp.concatenate([wq, wk, wv], axis=-1)
    params["bqkv"] = jnp.concatenate(
        [bias((NUM_LAYERS, 1, DIM)) for _ in range(3)], axis=-1)

    params["wo"] = xavier((NUM_LAYERS, DIM, DIM), DIM, DIM)
    params["bo"] = bias((NUM_LAYERS, 1, DIM))
    params["g1"] = jnp.ones((NUM_LAYERS, 1, DIM), jnp.float32)
    params["be1"] = jnp.zeros((NUM_LAYERS, 1, DIM), jnp.float32)
    params["w1"] = xavier((NUM_LAYERS, DIM, FF_DIM), DIM, FF_DIM)
    params["bf1"] = bias((NUM_LAYERS, 1, FF_DIM))
    params["w2"] = xavier((NUM_LAYERS, FF_DIM, DIM), FF_DIM, DIM)
    params["bf2"] = bias((NUM_LAYERS, 1, DIM))
    params["g2"] = jnp.ones((NUM_LAYERS, 1, DIM), jnp.float32)
    params["be2"] = jnp.zeros((NUM_LAYERS, 1, DIM), jnp.float32)

    # final LayerNorm
    params["norm_g"] = jnp.ones((1, DIM), jnp.float32)
    params["norm_b"] = jnp.zeros((1, DIM), jnp.float32)
    return params


if __name__ == "__main__":
    key = jax.random.PRNGKey(0)
    k_x, k_p = jax.random.split(key)
    x = jax.random.normal(k_x, (BATCH, IN_CH, IMAGE, IMAGE), jnp.float32)
    params = init_params(k_p)

    out, mask, lengths = jax.jit(vit_forward)(x, params)
    out = jax.block_until_ready(out)

    assert out.shape == (BATCH, SEQ, DIM)
    assert mask is None and lengths is None
    assert bool(jnp.all(jnp.isfinite(out)))
    print("KERNEL_OK")
</pallas_src>

<mosaic_0001>
module attributes {stable_mosaic.version = 11 : i64} {
  func.func @vit_kernel(%arg0: memref<8x256xf32, #tpu.memory_space<vmem>>, %arg1: memref<256x32xf32, #tpu.memory_space<vmem>>, %arg2: memref<1x32xf32, #tpu.memory_space<vmem>>, %arg3: memref<1x32xf32, #tpu.memory_space<vmem>>, %arg4: memref<5x32xf32, #tpu.memory_space<vmem>>, %arg5: memref<2x32x96xf32, #tpu.memory_space<vmem>>, %arg6: memref<2x1x96xf32, #tpu.memory_space<vmem>>, %arg7: memref<2x32x32xf32, #tpu.memory_space<vmem>>, %arg8: memref<2x1x32xf32, #tpu.memory_space<vmem>>, %arg9: memref<2x1x32xf32, #tpu.memory_space<vmem>>, %arg10: memref<2x1x32xf32, #tpu.memory_space<vmem>>, %arg11: memref<2x32x64xf32, #tpu.memory_space<vmem>>, %arg12: memref<2x1x64xf32, #tpu.memory_space<vmem>>, %arg13: memref<2x64x32xf32, #tpu.memory_space<vmem>>, %arg14: memref<2x1x32xf32, #tpu.memory_space<vmem>>, %arg15: memref<2x1x32xf32, #tpu.memory_space<vmem>>, %arg16: memref<2x1x32xf32, #tpu.memory_space<vmem>>, %arg17: memref<1x32xf32, #tpu.memory_space<vmem>>, %arg18: memref<1x32xf32, #tpu.memory_space<vmem>>, %arg19: memref<16x128xf32, #tpu.memory_space<vmem>>) attributes {dimension_semantics = [], scalar_prefetch = 0 : i64, scratch_operands = 0 : i64, tpu.core_type = #tpu.core_type<tc>} {
    %c0 = arith.constant 0 : index
    %c0_0 = arith.constant 0 : index
    %0 = vector.load %arg0[%c0, %c0_0] : memref<8x256xf32, #tpu.memory_space<vmem>>, vector<8x256xf32>
    %c0_1 = arith.constant 0 : index
    %c0_2 = arith.constant 0 : index
    %1 = vector.load %arg1[%c0_1, %c0_2] : memref<256x32xf32, #tpu.memory_space<vmem>>, vector<256x32xf32>
    %cst = arith.constant dense<0.000000e+00> : vector<8x32xf32>
    %2 = tpu.matmul %0, %1, %cst {dimension_numbers = #tpu.dot_dimension_numbers<[1], [0], [0], [1], [0, 0, 1, 1], [], []>} : vector<8x256xf32>, vector<256x32xf32>, vector<8x32xf32> -> vector<8x32xf32>
    %c0_3 = arith.constant 0 : index
    %c0_4 = arith.constant 0 : index
    %3 = vector.load %arg2[%c0_3, %c0_4] : memref<1x32xf32, #tpu.memory_space<vmem>>, vector<1x32xf32>
    %4 = vector.broadcast %3 : vector<1x32xf32> to vector<8x32xf32>
    %5 = arith.addf %2, %4 : vector<8x32xf32>
    %6 = vector.shape_cast %5 : vector<8x32xf32> to vector<2x4x32xf32>
    %c0_5 = arith.constant 0 : index
    %c0_6 = arith.constant 0 : index
    %7 = vector.load %arg3[%c0_5, %c0_6] : memref<1x32xf32, #tpu.memory_space<vmem>>, vector<1x32xf32>
    %c0_7 = arith.constant 0 : index
    %c0_8 = arith.constant 0 : index
    %8 = vector.load %arg4[%c0_7, %c0_8] : memref<5x32xf32, #tpu.memory_space<vmem>>, vector<1x32xf32>
    %9 = arith.addf %7, %8 : vector<1x32xf32>
    %c1 = arith.constant 1 : index
    %c0_9 = arith.constant 0 : index
    %10 = vector.load %arg4[%c1, %c0_9] : memref<5x32xf32, #tpu.memory_space<vmem>>, vector<4x32xf32>
    %11 = vector.shape_cast %10 : vector<4x32xf32> to vector<1x4x32xf32>
    %12 = vector.broadcast %11 : vector<1x4x32xf32> to vector<2x4x32xf32>
    %13 = arith.addf %6, %12 : vector<2x4x32xf32>
    %14 = vector.shape_cast %9 : vector<1x32xf32> to vector<1x1x32xf32>
    %15 = vector.shape_cast %14 : vector<1x1x32xf32> to vector<1x1x32xf32>
    %16 = vector.broadcast %15 : vector<1x1x32xf32> to vector<2x1x32xf32>
    %cst_10 = arith.constant 0.000000e+00 : f32
    %17 = vector.broadcast %cst_10 : f32 to vector<2x3x32xf32>
    %18 = tpu.concatenate %16, %13, %17 in 1 : vector<2x1x32xf32>, vector<2x4x32xf32>, vector<2x3x32xf32> -> vector<2x8x32xf32>
    %19 = vector.shape_cast %18 : vector<2x8x32xf32> to vector<16x32xf32>
    %20 = tpu.iota {dimensions = array<i32: 2>} : vector<1x8x8xi32>
    %c5_i32 = arith.constant 5 : i32
    %21 = vector.broadcast %c5_i32 : i32 to vector<1x8x8xi32>
    %22 = arith.cmpi slt, %20, %21 : vector<1x8x8xi32>
    %c0_11 = arith.constant 0 : index
    %c0_12 = arith.constant 0 : index
    %c0_13 = arith.constant 0 : index
    %23 = vector.load %arg9[%c0_11, %c0_12, %c0_13] : memref<2x1x32xf32, #tpu.memory_space<vmem>>, vector<1x1x32xf32>
    %24 = vector.shape_cast %23 : vector<1x1x32xf32> to vector<1x32xf32>
    %c0_14 = arith.constant 0 : index
    %c0_15 = arith.constant 0 : index
    %c0_16 = arith.constant 0 : index
    %25 = vector.load %arg10[%c0_14, %c0_15, %c0_16] : memref<2x1x32xf32, #tpu.memory_space<vmem>>, vector<1x1x32xf32>
    %26 = vector.shape_cast %25 : vector<1x1x32xf32> to vector<1x32xf32>
    %cst_17 = arith.constant dense<0.000000e+00> : vector<16xf32>
    %27 = vector.multi_reduction <add>, %19, %cst_17 [1] : vector<16x32xf32> to vector<16xf32>
    %28 = vector.shape_cast %27 : vector<16xf32> to vector<16x1xf32>
    %cst_18 = arith.constant 3.200000e+01 : f32
    %29 = vector.broadcast %cst_18 : f32 to vector<16x1xf32>
    %30 = arith.divf %28, %29 : vector<16x1xf32>
    %31 = vector.broadcast %30 : vector<16x1xf32> to vector<16x32xf32>
    %32 = arith.subf %19, %31 : vector<16x32xf32>
    %33 = arith.mulf %32, %32 : vector<16x32xf32>
    %cst_19 = arith.constant dense<0.000000e+00> : vector<16xf32>
    %34 = vector.multi_reduction <add>, %33, %cst_19 [1] : vector<16x32xf32> to vector<16xf32>
    %35 = vector.shape_cast %34 : vector<16xf32> to vector<16x1xf32>
    %cst_20 = arith.constant 3.200000e+01 : f32
    %36 = vector.broadcast %cst_20 : f32 to vector<16x1xf32>
    %37 = arith.divf %35, %36 : vector<16x1xf32>
    %cst_21 = arith.constant 9.99999997E-7 : f32
    %38 = vector.broadcast %cst_21 : f32 to vector<16x1xf32>
    %39 = arith.addf %37, %38 : vector<16x1xf32>
    %40 = math.rsqrt %39 : vector<16x1xf32>
    %41 = vector.broadcast %40 : vector<16x1xf32> to vector<16x32xf32>
    %42 = arith.mulf %32, %41 : vector<16x32xf32>
    %43 = vector.broadcast %24 : vector<1x32xf32> to vector<16x32xf32>
    %44 = arith.mulf %42, %43 : vector<16x32xf32>
    %45 = vector.broadcast %26 : vector<1x32xf32> to vector<16x32xf32>
    %46 = arith.addf %44, %45 : vector<16x32xf32>
    %c0_22 = arith.constant 0 : index
    %c0_23 = arith.constant 0 : index
    %c0_24 = arith.constant 0 : index
    %47 = vector.load %arg5[%c0_22, %c0_23, %c0_24] : memref<2x32x96xf32, #tpu.memory_space<vmem>>, vector<1x32x96xf32>
    %48 = vector.shape_cast %47 : vector<1x32x96xf32> to vector<32x96xf32>
    %cst_25 = arith.constant dense<0.000000e+00> : vector<16x96xf32>
    %49 = tpu.matmul %46, %48, %cst_25 {dimension_numbers = #tpu.dot_dimension_numbers<[1], [0], [0], [1], [0, 0, 1, 1], [], []>} : vector<16x32xf32>, vector<32x96xf32>, vector<16x96xf32> -> vector<16x96xf32>
    %c0_26 = arith.constant 0 : index
    %c0_27 = arith.constant 0 : index
    %c0_28 = arith.constant 0 : index
    %50 = vector.load %arg6[%c0_26, %c0_27, %c0_28] : memref<2x1x96xf32, #tpu.memory_space<vmem>>, vector<1x1x96xf32>
    %51 = vector.shape_cast %50 : vector<1x1x96xf32> to vector<1x96xf32>
    %52 = vector.broadcast %51 : vector<1x96xf32> to vector<16x96xf32>
    %53 = arith.addf %49, %52 : vector<16x96xf32>
    %54 = vector.shape_cast %53 : vector<16x96xf32> to vector<2x8x96xf32>
    %55 = vector.extract_strided_slice %54 {offsets = [0, 0, 0], sizes = [2, 8, 8], strides = [1, 1, 1]} : vector<2x8x96xf32> to vector<2x8x8xf32>
    %56 = vector.extract_strided_slice %54 {offsets = [0, 0, 32], sizes = [2, 8, 8], strides = [1, 1, 1]} : vector<2x8x96xf32> to vector<2x8x8xf32>
    %57 = vector.extract_strided_slice %54 {offsets = [0, 0, 64], sizes = [2, 8, 8], strides = [1, 1, 1]} : vector<2x8x96xf32> to vector<2x8x8xf32>
    %58 = vector.extract_strided_slice %54 {offsets = [0, 0, 8], sizes = [2, 8, 8], strides = [1, 1, 1]} : vector<2x8x96xf32> to vector<2x8x8xf32>
    %59 = vector.extract_strided_slice %54 {offsets = [0, 0, 40], sizes = [2, 8, 8], strides = [1, 1, 1]} : vector<2x8x96xf32> to vector<2x8x8xf32>
    %60 = vector.extract_strided_slice %54 {offsets = [0, 0, 72], sizes = [2, 8, 8], strides = [1, 1, 1]} : vector<2x8x96xf32> to vector<2x8x8xf32>
    %61 = vector.extract_strided_slice %54 {offsets = [0, 0, 16], sizes = [2, 8, 8], strides = [1, 1, 1]} : vector<2x8x96xf32> to vector<2x8x8xf32>
    %62 = vector.extract_strided_slice %54 {offsets = [0, 0, 48], sizes = [2, 8, 8], strides = [1, 1, 1]} : vector<2x8x96xf32> to vector<2x8x8xf32>
    %63 = vector.extract_strided_slice %54 {offsets = [0, 0, 80], sizes = [2, 8, 8], strides = [1, 1, 1]} : vector<2x8x96xf32> to vector<2x8x8xf32>
    %64 = vector.extract_strided_slice %54 {offsets = [0, 0, 24], sizes = [2, 8, 8], strides = [1, 1, 1]} : vector<2x8x96xf32> to vector<2x8x8xf32>
    %65 = vector.extract_strided_slice %54 {offsets = [0, 0, 56], sizes = [2, 8, 8], strides = [1, 1, 1]} : vector<2x8x96xf32> to vector<2x8x8xf32>
    %66 = vector.extract_strided_slice %54 {offsets = [0, 0, 88], sizes = [2, 8, 8], strides = [1, 1, 1]} : vector<2x8x96xf32> to vector<2x8x8xf32>
    %67 = tpu.concatenate %55, %58, %61, %64 in 0 : vector<2x8x8xf32>, vector<2x8x8xf32>, vector<2x8x8xf32>, vector<2x8x8xf32> -> vector<8x8x8xf32>
    %68 = tpu.concatenate %56, %59, %62, %65 in 0 : vector<2x8x8xf32>, vector<2x8x8xf32>, vector<2x8x8xf32>, vector<2x8x8xf32> -> vector<8x8x8xf32>
    %69 = tpu.concatenate %57, %60, %63, %66 in 0 : vector<2x8x8xf32>, vector<2x8x8xf32>, vector<2x8x8xf32>, vector<2x8x8xf32> -> vector<8x8x8xf32>
    "tpu.trace_start"() <{level = 10 : i32, message = "bqd,bkd->bqk"}> : () -> ()
    %cst_29 = arith.constant dense<0.000000e+00> : vector<8x8x8xf32>
    %70 = tpu.matmul %67, %68, %cst_29 {dimension_numbers = #tpu.dot_dimension_numbers<[2], [2], [1], [1], [0, 0, 0, 1, 1, 1], [0], [0]>} : vector<8x8x8xf32>, vector<8x8x8xf32>, vector<8x8x8xf32> -> vector<8x8x8xf32>
    "tpu.trace_stop"() : () -> ()
    %cst_30 = arith.constant 0.353553385 : f32
    %71 = vector.broadcast %cst_30 : f32 to vector<8x8x8xf32>
    %72 = arith.mulf %70, %71 : vector<8x8x8xf32>
    %cst_31 = arith.constant -1.000000e+30 : f32
    %73 = vector.shape_cast %22 : vector<1x8x8xi1> to vector<1x8x8xi1>
    %74 = vector.broadcast %73 : vector<1x8x8xi1> to vector<8x8x8xi1>
    %75 = vector.broadcast %cst_31 : f32 to vector<8x8x8xf32>
    %76 = arith.select %74, %72, %75 : vector<8x8x8xi1>, vector<8x8x8xf32>
    %cst_32 = arith.constant dense<0xFF800000> : vector<8x8xf32>
    %77 = vector.multi_reduction <maximumf>, %76, %cst_32 [2] : vector<8x8x8xf32> to vector<8x8xf32>
    %78 = vector.shape_cast %77 : vector<8x8xf32> to vector<8x8x1xf32>
    %79 = vector.broadcast %78 : vector<8x8x1xf32> to vector<8x8x8xf32>
    %80 = arith.subf %76, %79 : vector<8x8x8xf32>
    %81 = math.exp %80 : vector<8x8x8xf32>
    %cst_33 = arith.constant dense<0.000000e+00> : vector<8x8xf32>
    %82 = vector.multi_reduction <add>, %81, %cst_33 [2] : vector<8x8x8xf32> to vector<8x8xf32>
    %83 = vector.shape_cast %82 : vector<8x8xf32> to vector<8x8x1xf32>
    %84 = tpu.reciprocal %83 {approx = true} : vector<8x8x1xf32> -> vector<8x8x1xf32>
    %85 = vector.broadcast %84 : vector<8x8x1xf32> to vector<8x8x8xf32>
    %86 = arith.mulf %81, %85 : vector<8x8x8xf32>
    "tpu.trace_start"() <{level = 10 : i32, message = "bqk,bkd->bqd"}> : () -> ()
    %cst_34 = arith.constant dense<0.000000e+00> : vector<8x8x8xf32>
    %87 = tpu.matmul %86, %69, %cst_34 {dimension_numbers = #tpu.dot_dimension_numbers<[2], [1], [1], [2], [0, 0, 0, 1, 1, 2], [0], [0]>} : vector<8x8x8xf32>, vector<8x8x8xf32>, vector<8x8x8xf32> -> vector<8x8x8xf32>
    "tpu.trace_stop"() : () -> ()
    %88 = vector.extract_strided_slice %87 {offsets = [0, 0, 0], sizes = [2, 8, 8], strides = [1, 1, 1]} : vector<8x8x8xf32> to vector<2x8x8xf32>
    %89 = vector.extract_strided_slice %87 {offsets = [2, 0, 0], sizes = [2, 8, 8], strides = [1, 1, 1]} : vector<8x8x8xf32> to vector<2x8x8xf32>
    %90 = vector.extract_strided_slice %87 {offsets = [4, 0, 0], sizes = [2, 8, 8], strides = [1, 1, 1]} : vector<8x8x8xf32> to vector<2x8x8xf32>
    %91 = vector.extract_strided_slice %87 {offsets = [6, 0, 0], sizes = [2, 8, 8], strides = [1, 1, 1]} : vector<8x8x8xf32> to vector<2x8x8xf32>
    %92 = tpu.concatenate %88, %89, %90, %91 in 2 : vector<2x8x8xf32>, vector<2x8x8xf32>, vector<2x8x8xf32>, vector<2x8x8xf32> -> vector<2x8x32xf32>
    %93 = vector.shape_cast %92 : vector<2x8x32xf32> to vector<16x32xf32>
    %c0_35 = arith.constant 0 : index
    %c0_36 = arith.constant 0 : index
    %c0_37 = arith.constant 0 : index
    %94 = vector.load %arg7[%c0_35, %c0_36, %c0_37] : memref<2x32x32xf32, #tpu.memory_space<vmem>>, vector<1x32x32xf32>
    %95 = vector.shape_cast %94 : vector<1x32x32xf32> to vector<32x32xf32>
    %cst_38 = arith.constant dense<0.000000e+00> : vector<16x32xf32>
    %96 = tpu.matmul %93, %95, %cst_38 {dimension_numbers = #tpu.dot_dimension_numbers<[1], [0], [0], [1], [0, 0, 1, 1], [], []>} : vector<16x32xf32>, vector<32x32xf32>, vector<16x32xf32> -> vector<16x32xf32>
    %97 = arith.addf %19, %96 : vector<16x32xf32>
    %c0_39 = arith.constant 0 : index
    %c0_40 = arith.constant 0 : index
    %c0_41 = arith.constant 0 : index
    %98 = vector.load %arg8[%c0_39, %c0_40, %c0_41] : memref<2x1x32xf32, #tpu.memory_space<vmem>>, vector<1x1x32xf32>
    %99 = vector.shape_cast %98 : vector<1x1x32xf32> to vector<1x32xf32>
    %100 = vector.broadcast %99 : vector<1x32xf32> to vector<16x32xf32>
    %101 = arith.addf %97, %100 : vector<16x32xf32>
    %c0_42 = arith.constant 0 : index
    %c0_43 = arith.constant 0 : index
    %c0_44 = arith.constant 0 : index
    %102 = vector.load %arg15[%c0_42, %c0_43, %c0_44] : memref<2x1x32xf32, #tpu.memory_space<vmem>>, vector<1x1x32xf32>
    %103 = vector.shape_cast %102 : vector<1x1x32xf32> to vector<1x32xf32>
    %c0_45 = arith.constant 0 : index
    %c0_46 = arith.constant 0 : index
    %c0_47 = arith.constant 0 : index
    %104 = vector.load %arg16[%c0_45, %c0_46, %c0_47] : memref<2x1x32xf32, #tpu.memory_space<vmem>>, vector<1x1x32xf32>
    %105 = vector.shape_cast %104 : vector<1x1x32xf32> to vector<1x32xf32>
    %cst_48 = arith.constant dense<0.000000e+00> : vector<16xf32>
    %106 = vector.multi_reduction <add>, %101, %cst_48 [1] : vector<16x32xf32> to vector<16xf32>
    %107 = vector.shape_cast %106 : vector<16xf32> to vector<16x1xf32>
    %cst_49 = arith.constant 3.200000e+01 : f32
    %108 = vector.broadcast %cst_49 : f32 to vector<16x1xf32>
    %109 = arith.divf %107, %108 : vector<16x1xf32>
    %110 = vector.broadcast %109 : vector<16x1xf32> to vector<16x32xf32>
    %111 = arith.subf %101, %110 : vector<16x32xf32>
    %112 = arith.mulf %111, %111 : vector<16x32xf32>
    %cst_50 = arith.constant dense<0.000000e+00> : vector<16xf32>
    %113 = vector.multi_reduction <add>, %112, %cst_50 [1] : vector<16x32xf32> to vector<16xf32>
    %114 = vector.shape_cast %113 : vector<16xf32> to vector<16x1xf32>
    %cst_51 = arith.constant 3.200000e+01 : f32
    %115 = vector.broadcast %cst_51 : f32 to vector<16x1xf32>
    %116 = arith.divf %114, %115 : vector<16x1xf32>
    %cst_52 = arith.constant 9.99999997E-7 : f32
    %117 = vector.broadcast %cst_52 : f32 to vector<16x1xf32>
    %118 = arith.addf %116, %117 : vector<16x1xf32>
    %119 = math.rsqrt %118 : vector<16x1xf32>
    %120 = vector.broadcast %119 : vector<16x1xf32> to vector<16x32xf32>
    %121 = arith.mulf %111, %120 : vector<16x32xf32>
    %122 = vector.broadcast %103 : vector<1x32xf32> to vector<16x32xf32>
    %123 = arith.mulf %121, %122 : vector<16x32xf32>
    %124 = vector.broadcast %105 : vector<1x32xf32> to vector<16x32xf32>
    %125 = arith.addf %123, %124 : vector<16x32xf32>
    %c0_53 = arith.constant 0 : index
    %c0_54 = arith.constant 0 : index
    %c0_55 = arith.constant 0 : index
    %126 = vector.load %arg11[%c0_53, %c0_54, %c0_55] : memref<2x32x64xf32, #tpu.memory_space<vmem>>, vector<1x32x64xf32>
    %127 = vector.shape_cast %126 : vector<1x32x64xf32> to vector<32x64xf32>
    %cst_56 = arith.constant dense<0.000000e+00> : vector<16x64xf32>
    %128 = tpu.matmul %125, %127, %cst_56 {dimension_numbers = #tpu.dot_dimension_numbers<[1], [0], [0], [1], [0, 0, 1, 1], [], []>} : vector<16x32xf32>, vector<32x64xf32>, vector<16x64xf32> -> vector<16x64xf32>
    %c0_57 = arith.constant 0 : index
    %c0_58 = arith.constant 0 : index
    %c0_59 = arith.constant 0 : index
    %129 = vector.load %arg12[%c0_57, %c0_58, %c0_59] : memref<2x1x64xf32, #tpu.memory_space<vmem>>, vector<1x1x64xf32>
    %130 = vector.shape_cast %129 : vector<1x1x64xf32> to vector<1x64xf32>
    %131 = vector.broadcast %130 : vector<1x64xf32> to vector<16x64xf32>
    %132 = arith.addf %128, %131 : vector<16x64xf32>
    %cst_60 = arith.constant 5.000000e-01 : f32
    %133 = vector.broadcast %cst_60 : f32 to vector<16x64xf32>
    %134 = arith.mulf %133, %132 : vector<16x64xf32>
    %cst_61 = arith.constant 0.707106769 : f32
    %135 = vector.broadcast %cst_61 : f32 to vector<16x64xf32>
    %136 = arith.mulf %132, %135 : vector<16x64xf32>
    %137 = math.erf %136 : vector<16x64xf32>
    %cst_62 = arith.constant 1.000000e+00 : f32
    %138 = vector.broadcast %cst_62 : f32 to vector<16x64xf32>
    %139 = arith.addf %138, %137 : vector<16x64xf32>
    %140 = arith.mulf %134, %139 : vector<16x64xf32>
    %c0_63 = arith.constant 0 : index
    %c0_64 = arith.constant 0 : index
    %c0_65 = arith.constant 0 : index
    %141 = vector.load %arg13[%c0_63, %c0_64, %c0_65] : memref<2x64x32xf32, #tpu.memory_space<vmem>>, vector<1x64x32xf32>
    %142 = vector.shape_cast %141 : vector<1x64x32xf32> to vector<64x32xf32>
    %cst_66 = arith.constant dense<0.000000e+00> : vector<16x32xf32>
    %143 = tpu.matmul %140, %142, %cst_66 {dimension_numbers = #tpu.dot_dimension_numbers<[1], [0], [0], [1], [0, 0, 1, 1], [], []>} : vector<16x64xf32>, vector<64x32xf32>, vector<16x32xf32> -> vector<16x32xf32>
    %c0_67 = arith.constant 0 : index
    %c0_68 = arith.constant 0 : index
    %c0_69 = arith.constant 0 : index
    %144 = vector.load %arg14[%c0_67, %c0_68, %c0_69] : memref<2x1x32xf32, #tpu.memory_space<vmem>>, vector<1x1x32xf32>
    %145 = vector.shape_cast %144 : vector<1x1x32xf32> to vector<1x32xf32>
    %146 = vector.broadcast %145 : vector<1x32xf32> to vector<16x32xf32>
    %147 = arith.addf %143, %146 : vector<16x32xf32>
    %148 = arith.addf %101, %147 : vector<16x32xf32>
    %c1_70 = arith.constant 1 : index
    %c0_71 = arith.constant 0 : index
    %c0_72 = arith.constant 0 : index
    %149 = vector.load %arg9[%c1_70, %c0_71, %c0_72] : memref<2x1x32xf32, #tpu.memory_space<vmem>>, vector<1x1x32xf32>
    %150 = vector.shape_cast %149 : vector<1x1x32xf32> to vector<1x32xf32>
    %c1_73 = arith.constant 1 : index
    %c0_74 = arith.constant 0 : index
    %c0_75 = arith.constant 0 : index
    %151 = vector.load %arg10[%c1_73, %c0_74, %c0_75] : memref<2x1x32xf32, #tpu.memory_space<vmem>>, vector<1x1x32xf32>
    %152 = vector.shape_cast %151 : vector<1x1x32xf32> to vector<1x32xf32>
    %cst_76 = arith.constant dense<0.000000e+00> : vector<16xf32>
    %153 = vector.multi_reduction <add>, %148, %cst_76 [1] : vector<16x32xf32> to vector<16xf32>
    %154 = vector.shape_cast %153 : vector<16xf32> to vector<16x1xf32>
    %cst_77 = arith.constant 3.200000e+01 : f32
    %155 = vector.broadcast %cst_77 : f32 to vector<16x1xf32>
    %156 = arith.divf %154, %155 : vector<16x1xf32>
    %157 = vector.broadcast %156 : vector<16x1xf32> to vector<16x32xf32>
    %158 = arith.subf %148, %157 : vector<16x32xf32>
    %159 = arith.mulf %158, %158 : vector<16x32xf32>
    %cst_78 = arith.constant dense<0.000000e+00> : vector<16xf32>
    %160 = vector.multi_reduction <add>, %159, %cst_78 [1] : vector<16x32xf32> to vector<16xf32>
    %161 = vector.shape_cast %160 : vector<16xf32> to vector<16x1xf32>
    %cst_79 = arith.constant 3.200000e+01 : f32
    %162 = vector.broadcast %cst_79 : f32 to vector<16x1xf32>
    %163 = arith.divf %161, %162 : vector<16x1xf32>
    %cst_80 = arith.constant 9.99999997E-7 : f32
    %164 = vector.broadcast %cst_80 : f32 to vector<16x1xf32>
    %165 = arith.addf %163, %164 : vector<16x1xf32>
    %166 = math.rsqrt %165 : vector<16x1xf32>
    %167 = vector.broadcast %166 : vector<16x1xf32> to vector<16x32xf32>
    %168 = arith.mulf %158, %167 : vector<16x32xf32>
    %169 = vector.broadcast %150 : vector<1x32xf32> to vector<16x32xf32>
    %170 = arith.mulf %168, %169 : vector<16x32xf32>
    %171 = vector.broadcast %152 : vector<1x32xf32> to vector<16x32xf32>
    %172 = arith.addf %170, %171 : vector<16x32xf32>
    %c1_81 = arith.constant 1 : index
    %c0_82 = arith.constant 0 : index
    %c0_83 = arith.constant 0 : index
    %173 = vector.load %arg5[%c1_81, %c0_82, %c0_83] : memref<2x32x96xf32, #tpu.memory_space<vmem>>, vector<1x32x96xf32>
    %174 = vector.shape_cast %173 : vector<1x32x96xf32> to vector<32x96xf32>
    %cst_84 = arith.constant dense<0.000000e+00> : vector<16x96xf32>
    %175 = tpu.matmul %172, %174, %cst_84 {dimension_numbers = #tpu.dot_dimension_numbers<[1], [0], [0], [1], [0, 0, 1, 1], [], []>} : vector<16x32xf32>, vector<32x96xf32>, vector<16x96xf32> -> vector<16x96xf32>
    %c1_85 = arith.constant 1 : index
    %c0_86 = arith.constant 0 : index
    %c0_87 = arith.constant 0 : index
    %176 = vector.load %arg6[%c1_85, %c0_86, %c0_87] : memref<2x1x96xf32, #tpu.memory_space<vmem>>, vector<1x1x96xf32>
    %177 = vector.shape_cast %176 : vector<1x1x96xf32> to vector<1x96xf32>
    %178 = vector.broadcast %177 : vector<1x96xf32> to vector<16x96xf32>
    %179 = arith.addf %175, %178 : vector<16x96xf32>
    %180 = vector.shape_cast %179 : vector<16x96xf32> to vector<2x8x96xf32>
    %181 = vector.extract_strided_slice %180 {offsets = [0, 0, 0], sizes = [2, 8, 8], strides = [1, 1, 1]} : vector<2x8x96xf32> to vector<2x8x8xf32>
    %182 = vector.extract_strided_slice %180 {offsets = [0, 0, 32], sizes = [2, 8, 8], strides = [1, 1, 1]} : vector<2x8x96xf32> to vector<2x8x8xf32>
    %183 = vector.extract_strided_slice %180 {offsets = [0, 0, 64], sizes = [2, 8, 8], strides = [1, 1, 1]} : vector<2x8x96xf32> to vector<2x8x8xf32>
    %184 = vector.extract_strided_slice %180 {offsets = [0, 0, 8], sizes = [2, 8, 8], strides = [1, 1, 1]} : vector<2x8x96xf32> to vector<2x8x8xf32>
    %185 = vector.extract_strided_slice %180 {offsets = [0, 0, 40], sizes = [2, 8, 8], strides = [1, 1, 1]} : vector<2x8x96xf32> to vector<2x8x8xf32>
    %186 = vector.extract_strided_slice %180 {offsets = [0, 0, 72], sizes = [2, 8, 8], strides = [1, 1, 1]} : vector<2x8x96xf32> to vector<2x8x8xf32>
    %187 = vector.extract_strided_slice %180 {offsets = [0, 0, 16], sizes = [2, 8, 8], strides = [1, 1, 1]} : vector<2x8x96xf32> to vector<2x8x8xf32>
    %188 = vector.extract_strided_slice %180 {offsets = [0, 0, 48], sizes = [2, 8, 8], strides = [1, 1, 1]} : vector<2x8x96xf32> to vector<2x8x8xf32>
    %189 = vector.extract_strided_slice %180 {offsets = [0, 0, 80], sizes = [2, 8, 8], strides = [1, 1, 1]} : vector<2x8x96xf32> to vector<2x8x8xf32>
    %190 = vector.extract_strided_slice %180 {offsets = [0, 0, 24], sizes = [2, 8, 8], strides = [1, 1, 1]} : vector<2x8x96xf32> to vector<2x8x8xf32>
    %191 = vector.extract_strided_slice %180 {offsets = [0, 0, 56], sizes = [2, 8, 8], strides = [1, 1, 1]} : vector<2x8x96xf32> to vector<2x8x8xf32>
    %192 = vector.extract_strided_slice %180 {offsets = [0, 0, 88], sizes = [2, 8, 8], strides = [1, 1, 1]} : vector<2x8x96xf32> to vector<2x8x8xf32>
    %193 = tpu.concatenate %181, %184, %187, %190 in 0 : vector<2x8x8xf32>, vector<2x8x8xf32>, vector<2x8x8xf32>, vector<2x8x8xf32> -> vector<8x8x8xf32>
    %194 = tpu.concatenate %182, %185, %188, %191 in 0 : vector<2x8x8xf32>, vector<2x8x8xf32>, vector<2x8x8xf32>, vector<2x8x8xf32> -> vector<8x8x8xf32>
    %195 = tpu.concatenate %183, %186, %189, %192 in 0 : vector<2x8x8xf32>, vector<2x8x8xf32>, vector<2x8x8xf32>, vector<2x8x8xf32> -> vector<8x8x8xf32>
    "tpu.trace_start"() <{level = 10 : i32, message = "bqd,bkd->bqk"}> : () -> ()
    %cst_88 = arith.constant dense<0.000000e+00> : vector<8x8x8xf32>
    %196 = tpu.matmul %193, %194, %cst_88 {dimension_numbers = #tpu.dot_dimension_numbers<[2], [2], [1], [1], [0, 0, 0, 1, 1, 1], [0], [0]>} : vector<8x8x8xf32>, vector<8x8x8xf32>, vector<8x8x8xf32> -> vector<8x8x8xf32>
    "tpu.trace_stop"() : () -> ()
    %cst_89 = arith.constant 0.353553385 : f32
    %197 = vector.broadcast %cst_89 : f32 to vector<8x8x8xf32>
    %198 = arith.mulf %196, %197 : vector<8x8x8xf32>
    %cst_90 = arith.constant -1.000000e+30 : f32
    %199 = vector.shape_cast %22 : vector<1x8x8xi1> to vector<1x8x8xi1>
    %200 = vector.broadcast %199 : vector<1x8x8xi1> to vector<8x8x8xi1>
    %201 = vector.broadcast %cst_90 : f32 to vector<8x8x8xf32>
    %202 = arith.select %200, %198, %201 : vector<8x8x8xi1>, vector<8x8x8xf32>
    %cst_91 = arith.constant dense<0xFF800000> : vector<8x8xf32>
    %203 = vector.multi_reduction <maximumf>, %202, %cst_91 [2] : vector<8x8x8xf32> to vector<8x8xf32>
    %204 = vector.shape_cast %203 : vector<8x8xf32> to vector<8x8x1xf32>
    %205 = vector.broadcast %204 : vector<8x8x1xf32> to vector<8x8x8xf32>
    %206 = arith.subf %202, %205 : vector<8x8x8xf32>
    %207 = math.exp %206 : vector<8x8x8xf32>
    %cst_92 = arith.constant dense<0.000000e+00> : vector<8x8xf32>
    %208 = vector.multi_reduction <add>, %207, %cst_92 [2] : vector<8x8x8xf32> to vector<8x8xf32>
    %209 = vector.shape_cast %208 : vector<8x8xf32> to vector<8x8x1xf32>
    %210 = tpu.reciprocal %209 {approx = true} : vector<8x8x1xf32> -> vector<8x8x1xf32>
    %211 = vector.broadcast %210 : vector<8x8x1xf32> to vector<8x8x8xf32>
    %212 = arith.mulf %207, %211 : vector<8x8x8xf32>
    "tpu.trace_start"() <{level = 10 : i32, message = "bqk,bkd->bqd"}> : () -> ()
    %cst_93 = arith.constant dense<0.000000e+00> : vector<8x8x8xf32>
    %213 = tpu.matmul %212, %195, %cst_93 {dimension_numbers = #tpu.dot_dimension_numbers<[2], [1], [1], [2], [0, 0, 0, 1, 1, 2], [0], [0]>} : vector<8x8x8xf32>, vector<8x8x8xf32>, vector<8x8x8xf32> -> vector<8x8x8xf32>
    "tpu.trace_stop"() : () -> ()
    %214 = vector.extract_strided_slice %213 {offsets = [0, 0, 0], sizes = [2, 8, 8], strides = [1, 1, 1]} : vector<8x8x8xf32> to vector<2x8x8xf32>
    %215 = vector.extract_strided_slice %213 {offsets = [2, 0, 0], sizes = [2, 8, 8], strides = [1, 1, 1]} : vector<8x8x8xf32> to vector<2x8x8xf32>
    %216 = vector.extract_strided_slice %213 {offsets = [4, 0, 0], sizes = [2, 8, 8], strides = [1, 1, 1]} : vector<8x8x8xf32> to vector<2x8x8xf32>
    %217 = vector.extract_strided_slice %213 {offsets = [6, 0, 0], sizes = [2, 8, 8], strides = [1, 1, 1]} : vector<8x8x8xf32> to vector<2x8x8xf32>
    %218 = tpu.concatenate %214, %215, %216, %217 in 2 : vector<2x8x8xf32>, vector<2x8x8xf32>, vector<2x8x8xf32>, vector<2x8x8xf32> -> vector<2x8x32xf32>
    %219 = vector.shape_cast %218 : vector<2x8x32xf32> to vector<16x32xf32>
    %c1_94 = arith.constant 1 : index
    %c0_95 = arith.constant 0 : index
    %c0_96 = arith.constant 0 : index
    %220 = vector.load %arg7[%c1_94, %c0_95, %c0_96] : memref<2x32x32xf32, #tpu.memory_space<vmem>>, vector<1x32x32xf32>
    %221 = vector.shape_cast %220 : vector<1x32x32xf32> to vector<32x32xf32>
    %cst_97 = arith.constant dense<0.000000e+00> : vector<16x32xf32>
    %222 = tpu.matmul %219, %221, %cst_97 {dimension_numbers = #tpu.dot_dimension_numbers<[1], [0], [0], [1], [0, 0, 1, 1], [], []>} : vector<16x32xf32>, vector<32x32xf32>, vector<16x32xf32> -> vector<16x32xf32>
    %223 = arith.addf %148, %222 : vector<16x32xf32>
    %c1_98 = arith.constant 1 : index
    %c0_99 = arith.constant 0 : index
    %c0_100 = arith.constant 0 : index
    %224 = vector.load %arg8[%c1_98, %c0_99, %c0_100] : memref<2x1x32xf32, #tpu.memory_space<vmem>>, vector<1x1x32xf32>
    %225 = vector.shape_cast %224 : vector<1x1x32xf32> to vector<1x32xf32>
    %226 = vector.broadcast %225 : vector<1x32xf32> to vector<16x32xf32>
    %227 = arith.addf %223, %226 : vector<16x32xf32>
    %c1_101 = arith.constant 1 : index
    %c0_102 = arith.constant 0 : index
    %c0_103 = arith.constant 0 : index
    %228 = vector.load %arg15[%c1_101, %c0_102, %c0_103] : memref<2x1x32xf32, #tpu.memory_space<vmem>>, vector<1x1x32xf32>
    %229 = vector.shape_cast %228 : vector<1x1x32xf32> to vector<1x32xf32>
    %c1_104 = arith.constant 1 : index
    %c0_105 = arith.constant 0 : index
    %c0_106 = arith.constant 0 : index
    %230 = vector.load %arg16[%c1_104, %c0_105, %c0_106] : memref<2x1x32xf32, #tpu.memory_space<vmem>>, vector<1x1x32xf32>
    %231 = vector.shape_cast %230 : vector<1x1x32xf32> to vector<1x32xf32>
    %cst_107 = arith.constant dense<0.000000e+00> : vector<16xf32>
    %232 = vector.multi_reduction <add>, %227, %cst_107 [1] : vector<16x32xf32> to vector<16xf32>
    %233 = vector.shape_cast %232 : vector<16xf32> to vector<16x1xf32>
    %cst_108 = arith.constant 3.200000e+01 : f32
    %234 = vector.broadcast %cst_108 : f32 to vector<16x1xf32>
    %235 = arith.divf %233, %234 : vector<16x1xf32>
    %236 = vector.broadcast %235 : vector<16x1xf32> to vector<16x32xf32>
    %237 = arith.subf %227, %236 : vector<16x32xf32>
    %238 = arith.mulf %237, %237 : vector<16x32xf32>
    %cst_109 = arith.constant dense<0.000000e+00> : vector<16xf32>
    %239 = vector.multi_reduction <add>, %238, %cst_109 [1] : vector<16x32xf32> to vector<16xf32>
    %240 = vector.shape_cast %239 : vector<16xf32> to vector<16x1xf32>
    %cst_110 = arith.constant 3.200000e+01 : f32
    %241 = vector.broadcast %cst_110 : f32 to vector<16x1xf32>
    %242 = arith.divf %240, %241 : vector<16x1xf32>
    %cst_111 = arith.constant 9.99999997E-7 : f32
    %243 = vector.broadcast %cst_111 : f32 to vector<16x1xf32>
    %244 = arith.addf %242, %243 : vector<16x1xf32>
    %245 = math.rsqrt %244 : vector<16x1xf32>
    %246 = vector.broadcast %245 : vector<16x1xf32> to vector<16x32xf32>
    %247 = arith.mulf %237, %246 : vector<16x32xf32>
    %248 = vector.broadcast %229 : vector<1x32xf32> to vector<16x32xf32>
    %249 = arith.mulf %247, %248 : vector<16x32xf32>
    %250 = vector.broadcast %231 : vector<1x32xf32> to vector<16x32xf32>
    %251 = arith.addf %249, %250 : vector<16x32xf32>
    %c1_112 = arith.constant 1 : index
    %c0_113 = arith.constant 0 : index
    %c0_114 = arith.constant 0 : index
    %252 = vector.load %arg11[%c1_112, %c0_113, %c0_114] : memref<2x32x64xf32, #tpu.memory_space<vmem>>, vector<1x32x64xf32>
    %253 = vector.shape_cast %252 : vector<1x32x64xf32> to vector<32x64xf32>
    %cst_115 = arith.constant dense<0.000000e+00> : vector<16x64xf32>
    %254 = tpu.matmul %251, %253, %cst_115 {dimension_numbers = #tpu.dot_dimension_numbers<[1], [0], [0], [1], [0, 0, 1, 1], [], []>} : vector<16x32xf32>, vector<32x64xf32>, vector<16x64xf32> -> vector<16x64xf32>
    %c1_116 = arith.constant 1 : index
    %c0_117 = arith.constant 0 : index
    %c0_118 = arith.constant 0 : index
    %255 = vector.load %arg12[%c1_116, %c0_117, %c0_118] : memref<2x1x64xf32, #tpu.memory_space<vmem>>, vector<1x1x64xf32>
    %256 = vector.shape_cast %255 : vector<1x1x64xf32> to vector<1x64xf32>
    %257 = vector.broadcast %256 : vector<1x64xf32> to vector<16x64xf32>
    %258 = arith.addf %254, %257 : vector<16x64xf32>
    %cst_119 = arith.constant 5.000000e-01 : f32
    %259 = vector.broadcast %cst_119 : f32 to vector<16x64xf32>
    %260 = arith.mulf %259, %258 : vector<16x64xf32>
    %cst_120 = arith.constant 0.707106769 : f32
    %261 = vector.broadcast %cst_120 : f32 to vector<16x64xf32>
    %262 = arith.mulf %258, %261 : vector<16x64xf32>
    %263 = math.erf %262 : vector<16x64xf32>
    %cst_121 = arith.constant 1.000000e+00 : f32
    %264 = vector.broadcast %cst_121 : f32 to vector<16x64xf32>
    %265 = arith.addf %264, %263 : vector<16x64xf32>
    %266 = arith.mulf %260, %265 : vector<16x64xf32>
    %c1_122 = arith.constant 1 : index
    %c0_123 = arith.constant 0 : index
    %c0_124 = arith.constant 0 : index
    %267 = vector.load %arg13[%c1_122, %c0_123, %c0_124] : memref<2x64x32xf32, #tpu.memory_space<vmem>>, vector<1x64x32xf32>
    %268 = vector.shape_cast %267 : vector<1x64x32xf32> to vector<64x32xf32>
    %cst_125 = arith.constant dense<0.000000e+00> : vector<16x32xf32>
    %269 = tpu.matmul %266, %268, %cst_125 {dimension_numbers = #tpu.dot_dimension_numbers<[1], [0], [0], [1], [0, 0, 1, 1], [], []>} : vector<16x64xf32>, vector<64x32xf32>, vector<16x32xf32> -> vector<16x32xf32>
    %c1_126 = arith.constant 1 : index
    %c0_127 = arith.constant 0 : index
    %c0_128 = arith.constant 0 : index
    %270 = vector.load %arg14[%c1_126, %c0_127, %c0_128] : memref<2x1x32xf32, #tpu.memory_space<vmem>>, vector<1x1x32xf32>
    %271 = vector.shape_cast %270 : vector<1x1x32xf32> to vector<1x32xf32>
    %272 = vector.broadcast %271 : vector<1x32xf32> to vector<16x32xf32>
    %273 = arith.addf %269, %272 : vector<16x32xf32>
    %274 = arith.addf %227, %273 : vector<16x32xf32>
    %c0_129 = arith.constant 0 : index
    %c0_130 = arith.constant 0 : index
    %275 = vector.load %arg17[%c0_129, %c0_130] : memref<1x32xf32, #tpu.memory_space<vmem>>, vector<1x32xf32>
    %c0_131 = arith.constant 0 : index
    %c0_132 = arith.constant 0 : index
    %276 = vector.load %arg18[%c0_131, %c0_132] : memref<1x32xf32, #tpu.memory_space<vmem>>, vector<1x32xf32>
    %cst_133 = arith.constant dense<0.000000e+00> : vector<16xf32>
    %277 = vector.multi_reduction <add>, %274, %cst_133 [1] : vector<16x32xf32> to vector<16xf32>
    %278 = vector.shape_cast %277 : vector<16xf32> to vector<16x1xf32>
    %cst_134 = arith.constant 3.200000e+01 : f32
    %279 = vector.broadcast %cst_134 : f32 to vector<16x1xf32>
    %280 = arith.divf %278, %279 : vector<16x1xf32>
    %281 = vector.broadcast %280 : vector<16x1xf32> to vector<16x32xf32>
    %282 = arith.subf %274, %281 : vector<16x32xf32>
    %283 = arith.mulf %282, %282 : vector<16x32xf32>
    %cst_135 = arith.constant dense<0.000000e+00> : vector<16xf32>
    %284 = vector.multi_reduction <add>, %283, %cst_135 [1] : vector<16x32xf32> to vector<16xf32>
    %285 = vector.shape_cast %284 : vector<16xf32> to vector<16x1xf32>
    %cst_136 = arith.constant 3.200000e+01 : f32
    %286 = vector.broadcast %cst_136 : f32 to vector<16x1xf32>
    %287 = arith.divf %285, %286 : vector<16x1xf32>
    %cst_137 = arith.constant 9.99999997E-7 : f32
    %288 = vector.broadcast %cst_137 : f32 to vector<16x1xf32>
    %289 = arith.addf %287, %288 : vector<16x1xf32>
    %290 = math.rsqrt %289 : vector<16x1xf32>
    %291 = vector.broadcast %290 : vector<16x1xf32> to vector<16x32xf32>
    %292 = arith.mulf %282, %291 : vector<16x32xf32>
    %293 = vector.broadcast %275 : vector<1x32xf32> to vector<16x32xf32>
    %294 = arith.mulf %292, %293 : vector<16x32xf32>
    %295 = vector.broadcast %276 : vector<1x32xf32> to vector<16x32xf32>
    %296 = arith.addf %294, %295 : vector<16x32xf32>
    %cst_138 = arith.constant 0.000000e+00 : f32
    %297 = vector.broadcast %cst_138 : f32 to vector<16x96xf32>
    %298 = tpu.concatenate %296, %297 in 1 : vector<16x32xf32>, vector<16x96xf32> -> vector<16x128xf32>
    %c0_139 = arith.constant 0 : index
    %c0_140 = arith.constant 0 : index
    %299 = vector.load %arg19[%c0_139, %c0_140] : memref<16x128xf32, #tpu.memory_space<vmem>>, vector<16x128xf32>
    tpu.vector_store %arg19[%c0_139, %c0_140], %298 {strides = array<i32>} : memref<16x128xf32, #tpu.memory_space<vmem>>, vector<16x128xf32>,
    return
  }
}

</mosaic_0001>

<bundles_post_ra>
// kernel: vit_forward.1
= control target key start
LH: loop header
LB: loop body
LE: loop exit
PB: predicated region body
PF: predicated region fallthrough
CT: control target
= control target key end

     0   :  { %vm160_vm0 = vcmask 1040384   ;;  %vm163_vm1 = vcmask 1044480   ;;  %vm171_vm2 = vcmask 261120   ;;  %v2351_v56 = vmov 32.0   ;;  %s2352_s23 = smov 120   ;;  %s2353_s24 = smov 104   ;;  %s3169_s1 = inlined_call_operand.vmem [shape: f32[256,32], index: 1, kind: input, shape index: {}]   ;;  %s3170_s2 = inlined_call_operand.vmem [shape: f32[1,32], index: 2, kind: input, shape index: {}]   ;;  %s3171_s0 = inlined_call_operand.vmem [shape: f32[8,256], index: 0, kind: input, shape index: {}]   ;;  %s3172_s4 = inlined_call_operand.vmem [shape: f32[5,32], index: 4, kind: input, shape index: {}]   ;;  %s3173_s3 = inlined_call_operand.vmem [shape: f32[1,32], index: 3, kind: input, shape index: {}]   ;;  %s3174_s9 = inlined_call_operand.vmem [shape: f32[2,1,32], index: 9, kind: input, shape index: {}]   ;;  %s3175_s10 = inlined_call_operand.vmem [shape: f32[2,1,32], index: 10, kind: input, shape index: {}]   ;;  %s3176_s6 = inlined_call_operand.vmem [shape: f32[2,1,96], index: 6, kind: input, shape index: {}]   ;;  %s3177_s5 = inlined_call_operand.vmem [shape: f32[2,32,96], index: 5, kind: input, shape index: {}]   ;;  %s3178_s8 = inlined_call_operand.vmem [shape: f32[2,1,32], index: 8, kind: input, shape index: {}]   ;;  %s3179_s7 = inlined_call_operand.vmem [shape: f32[2,32,32], index: 7, kind: input, shape index: {}]   ;;  %s3180_s15 = inlined_call_operand.vmem [shape: f32[2,1,32], index: 15, kind: input, shape index: {}]   ;;  %s3181_s16 = inlined_call_operand.vmem [shape: f32[2,1,32], index: 16, kind: input, shape index: {}]   ;;  %s3182_s12 = inlined_call_operand.vmem [shape: f32[2,1,64], index: 12, kind: input, shape index: {}]   ;;  %s3183_s11 = inlined_call_operand.vmem [shape: f32[2,32,64], index: 11, kind: input, shape index: {}]   ;;  %s3184_s14 = inlined_call_operand.vmem [shape: f32[2,1,32], index: 14, kind: input, shape index: {}]   ;;  %s3185_s13 = inlined_call_operand.vmem [shape: f32[2,64,32], index: 13, kind: input, shape index: {}]   ;;  %s3186_s17 = inlined_call_operand.vmem [shape: f32[1,32], index: 17, kind: input, shape index: {}]   ;;  %s3187_s18 = inlined_call_operand.vmem [shape: f32[1,32], index: 18, kind: input, shape index: {}]   ;;  %s3188_s19 = inlined_call_operand.vmem [shape: f32[16,128], index: 19, kind: output, shape index: {}]  }
   0x1   :  { %3192 = sst [smem:[#allocation2_spill]] %s3169_s1  ;;  %v143_v43 = vld [vmem:[%s3173_s3] sm:$0x1]  ;;  %2257 = vrcp.f32 %v2351_v56  ;;  %s2354_s3 = smov 112   ;;  %vm286_vm10 = vcmask 64512   ;;  %vm833_vm12 = vcmask 130048  }
   0x2   :  { %3193 = sst [smem:[#allocation3_spill]] %s3170_s2  ;;  %s2355_s25 = smov 96   ;;  %vm836_vm13 = vcmask 195584  }
   0x3   :  { %3194 = sst [smem:[#allocation4_spill]] %s3171_s0  ;;  %s2358_s27 = smov 16  }
   0x4   :  { %3195 = sst [smem:[#allocation5_spill]] %s3172_s4  ;;  %s2356_s4 = smov 64  }
   0x5   :  { %s3196_s20 = sld [smem:[#allocation2_spill]]  ;;  %s2359_s28 = smov 24  }
   0x6   :  { %s3197_s26 = sld [smem:[#allocation4_spill]] }
   0x7   :  { %s3198_s30 = sld [smem:[#allocation3_spill]]  ;;  %v2258_v57 = vpop.eup %2257 }
   0x8   :  { %s3199_s2 = sld [smem:[#allocation5_spill]]  ;;  %v179_v58 = vmul.f32 32.0, %v2258_v57  ;;  %vm183_vm3 = vweird.f32 %v2258_v57 }
   0xa   :  { %v180_v59 = vsub.f32 1.0, %v179_v58 }
   0xb   :  { %v79_v0 = vld [vmem:[%s3196_s20 + $0x78] sm:$0xff]  ;;  %v78_v1 = vld [vmem:[%s3196_s20 + $0x70] sm:$0xff]  ;;  %v77_v4 = vld [vmem:[%s3196_s20 + $0x68] sm:$0xff] }
   0xc   :  { %v95_v2 = vld [vmem:[%s3196_s20 + $0xf8] sm:$0xff]  ;;  %100 = vmatpush.msra.mxu0 %v79_v0  ;;  %v94_v3 = vld [vmem:[%s3196_s20 + $0xf0] sm:$0xff]  ;;  %v93_v5 = vld [vmem:[%s3196_s20 + $0xe8] sm:$0xff]  ;;  %v181_v60 = vmul.f32 %v2258_v57, %v180_v59  ;;  %v166_v59 = vlaneseq }
   0xd   :  { %120 = vmatpush.msra.mxu1 %v95_v2  ;;  %v76_v6 = vld [vmem:[%s3196_s20 + $0x60] sm:$0xff]  ;;  %v75_v8 = vld [vmem:[%s3196_s20 + $0x58] sm:$0xff]  ;;  %v74_v10 = vld [vmem:[%s3196_s20 + $0x50] sm:$0xff] }
   0xe   :  { %101 = vmatpush.msra.mxu0 %v78_v1  ;;  %v92_v7 = vld [vmem:[%s3196_s20 + $0xe0] sm:$0xff]  ;;  %v91_v9 = vld [vmem:[%s3196_s20 + $0xd8] sm:$0xff]  ;;  %v90_v11 = vld [vmem:[%s3196_s20 + $0xd0] sm:$0xff]  ;;  %v182_v61 = vadd.f32 %v2258_v57, %v181_v60 }
   0xf   :  { %121 = vmatpush.msra.mxu1 %v94_v3  ;;  %v73_v12 = vld [vmem:[%s3196_s20 + $0x48] sm:$0xff]  ;;  %v72_v14 = vld [vmem:[%s3196_s20 + $0x40] sm:$0xff]  ;;  %v71_v16 = vld [vmem:[%s3196_s20 + $0x38] sm:$0xff] }
  0x10   :  { %102 = vmatpush.msra.mxu0 %v77_v4  ;;  %v89_v13 = vld [vmem:[%s3196_s20 + $0xc8] sm:$0xff]  ;;  %v88_v15 = vld [vmem:[%s3196_s20 + $0xc0] sm:$0xff]  ;;  %v87_v17 = vld [vmem:[%s3196_s20 + $0xb8] sm:$0xff]  ;;  %v2582_v62 = vsel %vm183_vm3, %v2258_v57, %v182_v61  ;;  %v2674_v61 = vand.u32 127, %v166_v59 }
  0x11   :  { %122 = vmatpush.msra.mxu1 %v93_v5  ;;  %v70_v18 = vld [vmem:[%s3196_s20 + $0x30] sm:$0xff]  ;;  %v69_v20 = vld [vmem:[%s3196_s20 + $0x28] sm:$0xff]  ;;  %v68_v22 = vld [vmem:[%s3196_s20 + $0x20] sm:$0xff] }
  0x12   :  { %103 = vmatpush.msra.mxu0 %v76_v6  ;;  %v86_v19 = vld [vmem:[%s3196_s20 + $0xb0] sm:$0xff]  ;;  %v85_v21 = vld [vmem:[%s3196_s20 + $0xa8] sm:$0xff]  ;;  %v84_v23 = vld [vmem:[%s3196_s20 + $0xa0] sm:$0xff]  ;;  %vm168_vm11 = vcmp.lt.s32.totalorder %v2674_v61, 5 }
  0x13   :  { %123 = vmatpush.msra.mxu1 %v92_v7  ;;  %v67_v24 = vld [vmem:[%s3196_s20 + $0x18] sm:$0xff]  ;;  %v66_v26 = vld [vmem:[%s3196_s20 + $0x10] sm:$0xff]  ;;  %v65_v28 = vld [vmem:[%s3196_s20 + $0x8] sm:$0xff] }
  0x14   :  { %104 = vmatpush.msra.mxu0 %v75_v8  ;;  %v83_v25 = vld [vmem:[%s3196_s20 + $0x98] sm:$0xff]  ;;  %v82_v27 = vld [vmem:[%s3196_s20 + $0x90] sm:$0xff]  ;;  %v81_v29 = vld [vmem:[%s3196_s20 + $0x88] sm:$0xff] }
  0x15   :  { %124 = vmatpush.msra.mxu1 %v91_v9  ;;  %v64_v30 = vld [vmem:[%s3196_s20] sm:$0xff]  ;;  %v63_v33 = vld [vmem:[%s3197_s26 + $0x8] sm:$0xff]  ;;  %v236_v9 = vld [vmem:[%s3177_s5 + $0x18] sm:$0xff] }
  0x16   :  { %105 = vmatpush.msra.mxu0 %v74_v10  ;;  %v80_v31 = vld [vmem:[%s3196_s20 + $0x80] sm:$0xff]  ;;  %259 = vmatpush.msra.mxu2 %v236_v9  ;;  %v235_v10 = vld [vmem:[%s3177_s5 + $0x10] sm:$0xff] }
  0x17   :  { %125 = vmatpush.msra.mxu1 %v90_v11  ;;  %v62_v32 = vld [vmem:[%s3197_s26] sm:$0xff]  ;;  %v234_v11 = vld [vmem:[%s3177_s5 + $0x8] sm:$0xff]  ;;  %s2357_s26 = smov 8  }
  0x18   :  { %106 = vmatpush.msra.mxu0 %v73_v12  ;;  %v2238_v34 = vld [vmem:[%s3198_s30] ss:$0 sm:$0xff]  ;;  %v146_v38 = vld [vmem:[%s3199_s2 + $0x1] sm:$0xf]  ;;  %260 = vmatpush.msra.mxu2 %v235_v10 }
  0x19   :  { %126 = vmatpush.msra.mxu1 %v89_v13  ;;  %v144_v44 = vld [vmem:[%s3199_s2] sm:$0x1] }
  0x1a   :  { %107 = vmatpush.msra.mxu0 %v72_v14  ;;  %v145_v45 = vadd.f32 %v144_v44, %v143_v43  ;;  %261 = vmatpush.msra.mxu2 %v234_v11  ;;  %v233_v12 = vld [vmem:[%s3177_s5] sm:$0xff] }
  0x1b   :  { %127 = vmatpush.msra.mxu1 %v88_v15 }
  0x1c   :  { %108 = vmatpush.msra.mxu0 %v71_v16  ;;  %262 = vmatpush.msra.mxu2 %v233_v12 }
  0x1d   :  { %128 = vmatpush.msra.mxu1 %v87_v17 }
  0x1e   :  { %109 = vmatpush.msra.mxu0 %v70_v18 }
  0x1f   :  { %129 = vmatpush.msra.mxu1 %v86_v19 }
  0x20   :  { %110 = vmatpush.msra.mxu0 %v69_v20 }
  0x21   :  { %130 = vmatpush.msra.mxu1 %v85_v21 }
  0x22   :  { %111 = vmatpush.msra.mxu0 %v68_v22 }
  0x23   :  { %131 = vmatpush.msra.mxu1 %v84_v23 }
  0x24   :  { %112 = vmatpush.msra.mxu0 %v67_v24 }
  0x25   :  { %132 = vmatpush.msra.mxu1 %v83_v25 }
  0x26   :  { %113 = vmatpush.msra.mxu0 %v66_v26 }
  0x27   :  { %133 = vmatpush.msra.mxu1 %v82_v27  ;;  %v2239_v27 = vld [vmem:[%s3174_s9] ss:$0 sm:$0xff] }
  0x28   :  { %114 = vmatpush.msra.mxu0 %v65_v28 }
  0x29   :  { %134 = vmatpush.msra.mxu1 %v81_v29 }
  0x2a   :  { %115 = vmatpush.msra.mxu0 %v64_v30 }
  0x2b   :  { %135 = vmatpush.msra.mxu1 %v80_v31  ;;  %116 = vmatmul.f32.vlgmr.msra.gmra.mxu0 %v62_v32  ;;  %v2240_v31 = vld [vmem:[%s3175_s10] ss:$0 sm:$0xff] }
  0x2c   :  { %136 = vmatmul.f32.vlgmr.msra.gmra.mxu1 %v63_v33 }
  0xa8   :  { %v117_v35 = vpop.f32.mrf.mxu0 }
  0xa9   :  { %v137_v36 = vpop.f32.mrf.mxu1  ;;  %v118_v37 = vadd.f32 %v2238_v34, %v117_v35 }
  0xab   :  { %v138_v39 = vadd.f32 %v137_v36, %v118_v37 }
  0xad   :  { %v141_v40 = vrot.slane %v138_v39, 4  ;;  %v147_v41 = vadd.f32 %v146_v38, %v138_v39 }
  0xaf   :  { %v148_v42 = vadd.f32 %v146_v38, %v141_v40  ;;  %151 = vst [vmem:[#allocation1] ss:$2 sm:$0xff] %v147_v41  ;;  %v2243_v41 = vld [vmem:[%s3176_s6] ss:$0 sm:$0xff] }
  0xb1   :  { %154 = vst [vmem:[#allocation1 + $0x10] ss:$2 sm:$0xff] %v148_v42 }
  0xb6   :  { %v152_v46 = vld.sshfl [vmem:[#allocation1] sm:$0xff pattern:$0x75316420] }
  0xb7   :  { %v156_v47 = vrot.slane %v152_v46, 7 }
  0xb8   :  { %v155_v48 = vld.sshfl [vmem:[#allocation1 + $0x10] sm:$0xff pattern:$0x75316420] }
  0xb9   :  { %v161_v49 = vsel %vm160_vm0, %v145_v45, %v156_v47  ;;  %v157_v50 = vrot.slane %v155_v48, 7 }
  0xba   :  { %v2574_v51 = vsel %vm163_vm1, %v161_v49, 0.0 }
  0xbb   :  { %v172_v52 = vsel %vm171_vm2, %v2574_v51, 0.0  ;;  %v162_v53 = vsel %vm160_vm0, %v145_v45, %v157_v50 }
  0xbc   :  { %173 = vadd.xlane.f32.xlu0 %v172_v52  ;;  %v2578_v54 = vsel %vm163_vm1, %v162_v53, 0.0 }
  0xbd   :  { %v175_v55 = vsel %vm171_vm2, %v2578_v54, 0.0 }
  0xc4   :  { %176 = vadd.xlane.f32.xlu0 %v175_v55 }
 0x12f   :  { %v174_v63 = vpop.xlane.xlu0 %173 }
 0x130   :  { %v185_v0 = vmul.f32 %v2582_v62, %v174_v63 }
 0x132   :  { %v187_v1 = vsub.f32 %v2574_v51, %v185_v0 }
 0x134   :  { %v189_v2 = vmul.f32 %v187_v1, %v187_v1 }
 0x136   :  { %v191_v3 = vsel %vm171_vm2, %v189_v2, 0.0 }
 0x137   :  { %192 = vadd.xlane.f32.xlu1 %v191_v3  ;;  %v177_v4 = vpop.xlane.xlu0 %176 }
 0x138   :  { %v186_v5 = vmul.f32 %v2582_v62, %v177_v4 }
 0x13a   :  { %v188_v6 = vsub.f32 %v2578_v54, %v186_v5 }
 0x13c   :  { %v190_v7 = vmul.f32 %v188_v6, %v188_v6 }
 0x13e   :  { %v194_v8 = vsel %vm171_vm2, %v190_v7, 0.0 }
 0x13f   :  { %195 = vadd.xlane.f32.xlu1 %v194_v8 }
 0x1aa   :  { %v193_v13 = vpop.xlane.xlu1 %192 }
 0x1ab   :  { %v197_v14 = vmul.f32 %v193_v13, %v2582_v62 }
 0x1ad   :  { %v199_v15 = vadd.f32 1e-06, %v197_v14 }
 0x1af   :  { %2259 = vrsqrt.f32 %v199_v15  ;;  %vm207_vm5 = vweird.f32 %v199_v15 }
 0x1b2   :  { %v196_v16 = vpop.xlane.xlu1 %195 }
 0x1b3   :  { %v198_v17 = vmul.f32 %v196_v16, %v2582_v62 }
 0x1b5   :  { %v2260_v18 = vpop.eup %2259  ;;  %v200_v19 = vadd.f32 1e-06, %v198_v17 }
 0x1b6   :  { %v202_v20 = vmul.f32 %v2260_v18, %v199_v15  ;;  %vm208_vm4 = vweird.f32 %v2260_v18 }
 0x1b7   :  { %2261 = vrsqrt.f32 %v200_v19  ;;  %vm209_vm6 = vmor %vm207_vm5, %vm208_vm4  ;;  %vm217_vm8 = vweird.f32 %v200_v19 }
 0x1b8   :  { %v203_v21 = vmul.f32 %v2260_v18, %v202_v20 }
 0x1ba   :  { %v204_v22 = vmul.f32 0.5, %v203_v21 }
 0x1bc   :  { %v205_v23 = vsub.f32 1.5, %v204_v22 }
 0x1bd   :  { %v2262_v24 = vpop.eup %2261 }
 0x1be   :  { %v206_v25 = vmul.f32 %v2260_v18, %v205_v23  ;;  %v212_v26 = vmul.f32 %v2262_v24, %v200_v19  ;;  %vm218_vm7 = vweird.f32 %v2262_v24 }
 0x1bf   :  { %vm219_vm9 = vmor %vm217_vm8, %vm218_vm7 }
 0x1c0   :  { %v210_v28 = vsel %vm209_vm6, %v2260_v18, %v206_v25  ;;  %v213_v29 = vmul.f32 %v2262_v24, %v212_v26 }
 0x1c1   :  { %v221_v30 = vmul.f32 %v210_v28, %v187_v1 }
 0x1c2   :  { %v214_v32 = vmul.f32 0.5, %v213_v29 }
 0x1c3   :  { %v226_v33 = vmul.f32 %v2239_v27, %v221_v30 }
 0x1c4   :  { %v215_v34 = vsub.f32 1.5, %v214_v32 }
 0x1c5   :  { %v231_v35 = vadd.f32 %v2240_v31, %v226_v33 }
 0x1c6   :  { %v216_v36 = vmul.f32 %v2262_v24, %v215_v34 }
 0x1c7   :  { %2103 = vmatmul.msk.f32.vlgmr.msra.gmra.mxu2 %vm171_vm2, %v231_v35 }
 0x1c8   :  { %v220_v37 = vsel %vm219_vm9, %v2262_v24, %v216_v36  ;;  %vm1073_vm9 = vcmask 523264  }
 0x1c9   :  { %v222_v38 = vmul.f32 %v220_v37, %v188_v6 }
 0x1cb   :  { %v227_v39 = vmul.f32 %v2239_v27, %v222_v38 }
 0x1cd   :  { %v232_v40 = vadd.f32 %v2240_v31, %v227_v39 }
 0x1cf   :  { %2104 = vmatmul.msk.f32.gmra.mxu2 %vm171_vm2, %v232_v40 }
 0x24a   :  { %v264_v42 = vpop.f32.mrf.mxu2 }
 0x24b   :  { %v2615_v43 = vadd.f32 %v2243_v41, %v264_v42 }
 0x24d   :  { %272 = vrot.lane.b32.xlu2 %v2615_v43, %s2352_s23  ;;  %280 = vrot.lane.b32.xlu1 %v2615_v43, %s2353_s24 }
 0x252   :  { %v267_v44 = vpop.f32.mrf.mxu2 }
 0x253   :  { %v2621_v45 = vadd.f32 %v2243_v41, %v267_v44 }
 0x255   :  { %276 = vrot.lane.b32.xlu2 %v2615_v43, %s2354_s3  ;;  %274 = vrot.lane.b32.xlu0 %v2621_v45, %s2352_s23 }
 0x25d   :  { %284 = vrot.lane.b32.xlu2 %v2615_v43, %s2355_s25  ;;  %282 = vrot.lane.b32.xlu0 %v2621_v45, %s2353_s24 }
 0x265   :  { %278 = vrot.lane.b32.xlu2 %v2621_v45, %s2354_s3 }
 0x26d   :  { %311 = vrot.lane.b32.xlu2 %v2621_v45, %s2355_s25 }
 0x2a7   :  { %v2635_v46 = vpop.permute.xlu2 %272 }
 0x2a8   :  { %337 = vrot.lane.b32.xlu2 %v2635_v46, %s2355_s25  ;;  %v2208_v44 = vpack.i.bf16 %v2615_v43, %v2635_v46 }
 0x2af   :  { %v2639_v47 = vpop.permute.xlu2 %276 }
 0x2b0   :  { %389 = vrot.lane.b32.xlu1 %v2639_v47, %s2355_s25 }
 0x2b7   :  { %v285_v48 = vpop.permute.xlu2 %284 }
 0x2b8   :  { %2105 = vmatpush.xpose.msk.msra.mxu3 %vm286_vm10, %v285_v48 }
 0x2bb   :  { %2106 = vmatmul.msk.f32.vlgmr.msra.gmra.mxu3 %vm286_vm10, %v2615_v43 }
 0x2bf   :  { %v2646_v49 = vpop.permute.xlu2 %278  ;;  %v2648_v50 = vpop.permute.xlu1 %280 }
 0x2c0   :  { %415 = vrot.lane.b32.xlu1 %v2646_v49, %s2355_s25  ;;  %441 = vrot.lane.b32.xlu2 %v2648_v50, %s2355_s25 }
 0x2c7   :  { %v312_v52 = vpop.permute.xlu2 %311  ;;  %v2654_v53 = vpop.permute.xlu0 %274 }
 0x2c8   :  { %2107 = vmatpush.xpose.msk.msrb.mxu3 %vm286_vm10, %v312_v52  ;;  %363 = vrot.lane.b32.xlu0 %v2654_v53, %s2355_s25  ;;  %v2218_v48 = vpack.i.bf16 %v2654_v53, %v2639_v47 }
 0x2cb   :  { %2108 = vmatmul.msk.f32.vlgmr.msrb.gmra.mxu3 %vm286_vm10, %v2621_v45 }
 0x2cf   :  { %v2661_v55 = vpop.permute.xlu0 %282 }
 0x2d0   :  { %467 = vrot.lane.b32.xlu0 %v2661_v55, %s2355_s25 }
 0x302   :  { %v338_v56 = vpop.permute.xlu2 %337 }
 0x303   :  { %2109 = vmatpush.xpose.msk.msra.mxu3 %vm286_vm10, %v338_v56 }
 0x306   :  { %2110 = vmatmul.msk.f32.vlgmr.msra.gmra.mxu3 %vm286_vm10, %v2635_v46 }
 0x31a   :  { %v442_v58 = vpop.permute.xlu2 %441 }
 0x322   :  { %v390_v57 = vpop.permute.xlu1 %389 }
 0x323   :  { %2113 = vmatpush.xpose.msk.msrb.mxu3 %vm286_vm10, %v390_v57 }
 0x326   :  { %2114 = vmatmul.msk.f32.vlgmr.msrb.gmra.mxu3 %vm286_vm10, %v2639_v47 }
 0x327   :  { %2117 = vmatpush.xpose.msk.msra.mxu3 %vm286_vm10, %v442_v58 }
 0x32e   :  { %2118 = vmatmul.msk.f32.vlgmr.msra.gmra.mxu3 %vm286_vm10, %v2648_v50 }
 0x332   :  { %v416_v63 = vpop.permute.xlu1 %415 }
 0x33a   :  { %v364_v60 = vpop.permute.xlu0 %363 }
 0x33b   :  { %2111 = vmatpush.xpose.msk.msrb.mxu2 %vm286_vm10, %v364_v60 }
 0x33e   :  { %v308_v0 = vpop.f32.mrf.mxu3  ;;  %2112 = vmatmul.msk.f32.vlgmr.msrb.gmra.mxu2 %vm286_vm10, %v2654_v53 }
 0x33f   :  { %2115 = vmatpush.xpose.msk.msra.mxu2 %vm286_vm10, %v416_v63  ;;  %v493_v1 = vmul.f32 0.35355338, %v308_v0 }
 0x341   :  { %v503_v2 = vsel %vm168_vm11, %v493_v1, -1e+30 }
 0x342   :  { %v468_v3 = vpop.permute.xlu0 %467  ;;  %v511_v4 = vsel %vm286_vm10, %v503_v2, -inf }
 0x343   :  { %512 = vmax.xlane.f32.xlu1 %v511_v4  ;;  %2119 = vmatpush.xpose.msk.msrb.mxu1 %vm286_vm10, %v468_v3 }
 0x346   :  { %2116 = vmatmul.msk.f32.vlgmr.msra.gmra.mxu2 %vm286_vm10, %v2646_v49  ;;  %2120 = vmatmul.msk.f32.vlgmr.msrb.gmra.mxu1 %vm286_vm10, %v2661_v55 }
 0x34e   :  { %v334_v5 = vpop.f32.mrf.mxu3 }
 0x34f   :  { %v494_v6 = vmul.f32 0.35355338, %v334_v5 }
 0x351   :  { %v504_v7 = vsel %vm168_vm11, %v494_v6, -1e+30 }
 0x352   :  { %v514_v8 = vsel %vm286_vm10, %v504_v7, -inf }
 0x353   :  { %515 = vmax.xlane.f32.xlu0 %v514_v8 }
 0x389   :  { %v360_v9 = vpop.f32.mrf.mxu3 }
 0x38a   :  { %v495_v10 = vmul.f32 0.35355338, %v360_v9 }
 0x38c   :  { %v505_v11 = vsel %vm168_vm11, %v495_v10, -1e+30 }
 0x38d   :  { %v517_v12 = vsel %vm286_vm10, %v505_v11, -inf }
 0x38e   :  { %518 = vmax.xlane.f32.xlu2 %v517_v12 }
 0x3a9   :  { %v412_v13 = vpop.f32.mrf.mxu3 }
 0x3aa   :  { %v497_v30 = vmul.f32 0.35355338, %v412_v13 }
 0x3ac   :  { %v507_v36 = vsel %vm168_vm11, %v497_v30, -1e+30 }
 0x3ad   :  { %v523_v38 = vsel %vm286_vm10, %v507_v36, -inf }
 0x3b1   :  { %v464_v14 = vpop.f32.mrf.mxu3 }
 0x3b2   :  { %v499_v15 = vmul.f32 0.35355338, %v464_v14 }
 0x3b4   :  { %v509_v16 = vsel %vm168_vm11, %v499_v15, -1e+30 }
 0x3b5   :  { %v529_v17 = vsel %vm286_vm10, %v509_v16, -inf }
 0x3b6   :  { %530 = vmax.xlane.f32.xlu2 %v529_v17  ;;  %v513_v18 = vpop.xlane.xlu1 %512 }
 0x3b7   :  { %v535_v22 = vsub.f32 %v503_v2, %v513_v18 }
 0x3b9   :  { %v543_v31 = vmul.f32 1.442695, %v535_v22 }
 0x3bb   :  { %2263 = vpow2.f32 %v543_v31 }
 0x3c1   :  { %v386_v19 = vpop.f32.mrf.mxu2  ;;  %v2264_v39 = vpop.eup %2263 }
 0x3c2   :  { %v496_v20 = vmul.f32 0.35355338, %v386_v19  ;;  %v559_v41 = vsel %vm286_vm10, %v2264_v39, 0.0 }
 0x3c3   :  { %v490_v21 = vpop.f32.mrf.mxu1 }
 0x3c4   :  { %v500_v23 = vmul.f32 0.35355338, %v490_v21  ;;  %v506_v24 = vsel %vm168_vm11, %v496_v20, -1e+30 }
 0x3c5   :  { %v520_v25 = vsel %vm286_vm10, %v506_v24, -inf }
 0x3c6   :  { %521 = vmax.xlane.f32.xlu0 %v520_v25  ;;  %v516_v26 = vpop.xlane.xlu0 %515  ;;  %v510_v27 = vsel %vm168_vm11, %v500_v23, -1e+30 }
 0x3c7   :  { %v536_v28 = vsub.f32 %v504_v7, %v516_v26  ;;  %v532_v29 = vsel %vm286_vm10, %v510_v27, -inf }
 0x3c8   :  { %533 = vmax.xlane.f32.xlu1 %v532_v29 }
 0x3c9   :  { %v438_v32 = vpop.f32.mrf.mxu2  ;;  %v545_v33 = vmul.f32 1.442695, %v536_v28 }
 0x3ca   :  { %v498_v34 = vmul.f32 0.35355338, %v438_v32 }
 0x3cb   :  { %2265 = vpow2.f32 %v545_v33 }
 0x3cc   :  { %v508_v35 = vsel %vm168_vm11, %v498_v34, -1e+30 }
 0x3cd   :  { %v526_v37 = vsel %vm286_vm10, %v508_v35, -inf }
 0x3ce   :  { %527 = vmax.xlane.f32.xlu2 %v526_v37 }
 0x3d0   :  { %524 = vmax.xlane.f32.xlu1 %v523_v38 }
 0x3d1   :  { %v2710_v40 = vpop.eup %2265 }
 0x3d2   :  { %v562_v42 = vsel %vm286_vm10, %v2710_v40, 0.0 }
 0x3d6   :  { %560 = vadd.xlane.f32.xlu2 %v559_v41 }
 0x3d8   :  { %563 = vadd.xlane.f32.xlu1 %v562_v42 }
 0x3ee   :  { %2209 = vrot.lane.b32.xlu2 %v2208_v44, %s2356_s4 }
 0x3f6   :  { %2219 = vrot.lane.b32.xlu2 %v2218_v48, %s2356_s4 }
 0x3fe   :  { %781 = vrot.lane.b32.xlu2 %v2661_v55, %s2356_s4 }
 0x401   :  { %v519_v52 = vpop.xlane.xlu2 %518 }
 0x402   :  { %v537_v56 = vsub.f32 %v505_v11, %v519_v52 }
 0x404   :  { %v547_v57 = vmul.f32 1.442695, %v537_v56 }
 0x406   :  { %2267 = vpow2.f32 %v547_v57 }
 0x40c   :  { %v2268_v58 = vpop.eup %2267 }
 0x40d   :  { %v565_v59 = vsel %vm286_vm10, %v2268_v58, 0.0 }
 0x40e   :  { %566 = vadd.xlane.f32.xlu0 %v565_v59 }
 0x429   :  { %v531_v43 = vpop.xlane.xlu2 %530 }
 0x42a   :  { %v541_v0 = vsub.f32 %v509_v16, %v531_v43 }
 0x42c   :  { %v555_v47 = vmul.f32 1.442695, %v541_v0 }
 0x439   :  { %v522_v46 = vpop.xlane.xlu0 %521 }
 0x43a   :  { %v538_v60 = vsub.f32 %v506_v24, %v522_v46 }
 0x43b   :  { %v534_v63 = vpop.xlane.xlu1 %533 }
 0x43c   :  { %v549_v1 = vmul.f32 1.442695, %v538_v60  ;;  %v542_v5 = vsub.f32 %v510_v27, %v534_v63  ;;  %v2213_v27 = vpack.i.bf16 %v2648_v50, %v2621_v45 }
 0x43e   :  { %2269 = vpow2.f32 %v549_v1  ;;  %v557_v9 = vmul.f32 1.442695, %v542_v5  ;;  %v839_v5 = vld [vmem:[%s3179_s7] sm:$0xff] }
 0x43f   :  { %2271 = vpow2.f32 %v555_v47 }
 0x441   :  { %v528_v53 = vpop.xlane.xlu2 %527 }
 0x442   :  { %v540_v12 = vsub.f32 %v508_v35, %v528_v53 }
 0x443   :  { %v525_v2 = vpop.xlane.xlu1 %524 }
 0x444   :  { %v2270_v3 = vpop.eup %2269  ;;  %v539_v55 = vsub.f32 %v507_v36, %v525_v2  ;;  %v553_v16 = vmul.f32 1.442695, %v540_v12 }
 0x445   :  { %v568_v4 = vsel %vm286_vm10, %v2270_v3, 0.0  ;;  %v2725_v8 = vpop.eup %2271 }
 0x446   :  { %v551_v6 = vmul.f32 1.442695, %v539_v55  ;;  %569 = vadd.xlane.f32.xlu0 %v568_v4  ;;  %v577_v10 = vsel %vm286_vm10, %v2725_v8, 0.0  ;;  %v841_v55 = vld [vmem:[%s3179_s7 + $0x10] sm:$0xff]  ;;  %v840_v4 = vld [vmem:[%s3179_s7 + $0x8] sm:$0xff] }
 0x448   :  { %2273 = vpow2.f32 %v551_v6 }
 0x449   :  { %v561_v7 = vpop.xlane.xlu2 %560 }
 0x44a   :  { %2275 = vrcp.f32 %v561_v7 }
 0x44b   :  { %2277 = vpow2.f32 %v557_v9  ;;  %v564_v33 = vpop.xlane.xlu1 %563 }
 0x44c   :  { %2279 = vpow2.f32 %v553_v16 }
 0x44e   :  { %v2274_v11 = vpop.eup %2273  ;;  %578 = vadd.xlane.f32.xlu0 %v577_v10 }
 0x44f   :  { %v571_v13 = vsel %vm286_vm10, %v2274_v11, 0.0 }
 0x450   :  { %v2276_v14 = vpop.eup %2275  ;;  %572 = vadd.xlane.f32.xlu1 %v571_v13 }
 0x451   :  { %v2210_v15 = vpop.permute.xlu2 %2209  ;;  %v591_v19 = vmul.f32 %v2276_v14, %v2264_v39  ;;  %v2278_v20 = vpop.eup %2277 }
 0x452   :  { %v2212_v17 = vunpack.i.h.bf16 %v2210_v15  ;;  %v2211_v18 = vunpack.i.l.bf16 %v2210_v15  ;;  %v580_v21 = vsel %vm286_vm10, %v2278_v20, 0.0  ;;  %v2280_v25 = vpop.eup %2279 }
 0x453   :  { %v574_v26 = vsel %vm286_vm10, %v2280_v25, 0.0 }
 0x454   :  { %620 = vmatpush.msra.mxu1 %v2212_v17  ;;  %672 = vmatpush.msrb.mxu3 %v2211_v18  ;;  %v2244_v18 = vld [vmem:[%s3178_s8] ss:$0 sm:$0xff] }
 0x455   :  { %2121 = vmatmul.msk.f32.vlgmr.msra.gmra.mxu1 %vm286_vm10, %v591_v19 }
 0x458   :  { %581 = vadd.xlane.f32.xlu1 %v580_v21 }
 0x459   :  { %v2220_v22 = vpop.permute.xlu2 %2219 }
 0x45a   :  { %v2221_v23 = vunpack.i.l.bf16 %v2220_v22  ;;  %v2222_v24 = vunpack.i.h.bf16 %v2220_v22 }
 0x45c   :  { %698 = vmatpush.msrb.mxu0 %v2222_v24  ;;  %724 = vmatpush.msrb.mxu1 %v2221_v23 }
 0x460   :  { %575 = vadd.xlane.f32.xlu1 %v574_v26 }
 0x461   :  { %v782_v28 = vpop.permute.xlu2 %781 }
 0x462   :  { %2214 = vrot.lane.b32.xlu0 %v2213_v27, %s2356_s4  ;;  %802 = vmatpush.msra.mxu0 %v782_v28 }
 0x479   :  { %729 = vrot.lane.b32.xlu1 %v2646_v49, %s2356_s4 }
 0x481   :  { %v567_v29 = vpop.xlane.xlu0 %566 }
 0x482   :  { %2281 = vrcp.f32 %v567_v29 }
 0x488   :  { %v2282_v30 = vpop.eup %2281 }
 0x489   :  { %v593_v31 = vmul.f32 %v2282_v30, %v2268_v58 }
 0x48b   :  { %2123 = vmatmul.msk.f32.vlgmr.msrb.gmra.mxu3 %vm286_vm10, %v593_v31 }
 0x4b9   :  { %v570_v32 = vpop.xlane.xlu0 %569 }
 0x4ba   :  { %2283 = vrcp.f32 %v570_v32 }
 0x4c0   :  { %v2284_v34 = vpop.eup %2283 }
 0x4c1   :  { %v594_v35 = vmul.f32 %v2284_v34, %v2270_v3  ;;  %v579_v36 = vpop.xlane.xlu0 %578  ;;  %v842_v3 = vld [vmem:[%s3179_s7 + $0x18] sm:$0xff] }
 0x4c2   :  { %861 = vmatpush.msra.mxu1 %v842_v3 }
 0x4c3   :  { %2124 = vmatmul.msk.f32.vlgmr.msrb.gmra.mxu0 %vm286_vm10, %v594_v35  ;;  %v573_v45 = vpop.xlane.xlu1 %572  ;;  %v939_v35 = vld [vmem:[%s3183_s11 + $0x18] sm:$0xff] }
 0x4c4   :  { %2285 = vrcp.f32 %v573_v45  ;;  %862 = vmatpush.msra.mxu1 %v841_v55  ;;  %v938_v45 = vld [vmem:[%s3183_s11 + $0x10] sm:$0xff] }
 0x4c5   :  { %2287 = vrcp.f32 %v564_v33 }
 0x4c6   :  { %863 = vmatpush.msra.mxu1 %v840_v4 }
 0x4c8   :  { %864 = vmatpush.msra.mxu1 %v839_v5 }
 0x4ca   :  { %v2286_v50 = vpop.eup %2285 }
 0x4cb   :  { %v595_v37 = vmul.f32 %v2286_v50, %v2274_v11  ;;  %v582_v49 = vpop.xlane.xlu1 %581  ;;  %v2288_v38 = vpop.eup %2287  ;;  %v937_v50 = vld [vmem:[%s3183_s11 + $0x8] sm:$0xff] }
 0x4cc   :  { %2289 = vrcp.f32 %v582_v49  ;;  %v592_v56 = vmul.f32 %v2288_v38, %v2710_v40 }
 0x4cd   :  { %2291 = vrcp.f32 %v579_v36  ;;  %2125 = vmatmul.msk.f32.vlgmr.msrb.gmra.mxu1 %vm286_vm10, %v595_v37  ;;  %v936_v36 = vld [vmem:[%s3183_s11] sm:$0xff] }
 0x4d2   :  { %v2290_v39 = vpop.eup %2289  ;;  %v622_v40 = vpop.f32.mrf.mxu1 }
 0x4d3   :  { %v2292_v41 = vpop.eup %2291  ;;  %v598_v42 = vmul.f32 %v2290_v39, %v2278_v20  ;;  %v576_v58 = vpop.xlane.xlu1 %575 }
 0x4d4   :  { %v2215_v44 = vpop.permute.xlu0 %2214  ;;  %v597_v57 = vmul.f32 %v2292_v41, %v2725_v8  ;;  %2293 = vrcp.f32 %v576_v58 }
 0x4d5   :  { %v2217_v48 = vunpack.i.h.bf16 %v2215_v44  ;;  %v2216_v52 = vunpack.i.l.bf16 %v2215_v44  ;;  %2128 = vmatmul.msk.f32.vlgmr.msra.gmra.mxu0 %vm286_vm10, %v598_v42 }
 0x4d7   :  { %646 = vmatpush.msrb.mxu2 %v2216_v52  ;;  %776 = vmatpush.msra.mxu3 %v2217_v48 }
 0x4d8   :  { %2122 = vmatmul.msk.f32.vlgmr.msrb.gmra.mxu2 %vm286_vm10, %v592_v56  ;;  %2127 = vmatmul.msk.f32.vlgmr.msra.gmra.mxu3 %vm286_vm10, %v597_v57  ;;  %v2245_v56 = vld [vmem:[%s3180_s15] ss:$0 sm:$0xff] }
 0x4da   :  { %v2294_v59 = vpop.eup %2293 }
 0x4db   :  { %v596_v43 = vmul.f32 %v2294_v59, %v2280_v25 }
 0x4eb   :  { %v730_v46 = vpop.permute.xlu1 %729 }
 0x4ec   :  { %750 = vmatpush.msra.mxu2 %v730_v46  ;;  %v2246_v46 = vld [vmem:[%s3181_s16] ss:$0 sm:$0xff] }
 0x4ed   :  { %2126 = vmatmul.msk.f32.vlgmr.msra.gmra.mxu2 %vm286_vm10, %v596_v43 }
 0x4ee   :  { %962 = vmatpush.msrb.mxu2 %v939_v35 }
 0x4f0   :  { %963 = vmatpush.msrb.mxu2 %v938_v45 }
 0x4f2   :  { %964 = vmatpush.msrb.mxu2 %v937_v50 }
 0x4f4   :  { %965 = vmatpush.msrb.mxu2 %v936_v36 }
 0x50e   :  { %v674_v60 = vpop.f32.mrf.mxu3 }
 0x50f   :  { %809 = vrot.lane.b32.xlu0 %v674_v60, %s2357_s26 }
 0x540   :  { %v700_v63 = vpop.f32.mrf.mxu0 }
 0x54a   :  { %v726_v0 = vpop.f32.mrf.mxu1 }
 0x54b   :  { %817 = vrot.lane.b32.xlu2 %v726_v0, %s2358_s27 }
 0x552   :  { %v804_v1 = vpop.f32.mrf.mxu0 }
 0x553   :  { %811 = vrot.lane.b32.xlu2 %v700_v63, %s2357_s26  ;;  %827 = vrot.lane.b32.xlu1 %v804_v1, %s2359_s28 }
 0x55b   :  { %v778_v47 = vpop.f32.mrf.mxu3  ;;  %v648_v53 = vpop.f32.mrf.mxu2 }
 0x55c   :  { %825 = vrot.lane.b32.xlu0 %v778_v47, %s2359_s28 }
 0x570   :  { %v752_v2 = vpop.f32.mrf.mxu2 }
 0x571   :  { %819 = vrot.lane.b32.xlu0 %v752_v2, %s2358_s27 }
 0x581   :  { %v810_v6 = vpop.permute.xlu0 %809 }
 0x582   :  { %v831_v8 = vsel %vm286_vm10, %v622_v40, %v810_v6 }
 0x5a5   :  { %v818_v7 = vpop.permute.xlu2 %817 }
 0x5a6   :  { %v834_v9 = vsel %vm833_vm12, %v831_v8, %v818_v7  ;;  %v2247_v7 = vld [vmem:[%s3182_s12] ss:$0 sm:$0xff] }
 0x5ad   :  { %v812_v12 = vpop.permute.xlu2 %811 }
 0x5ae   :  { %v832_v13 = vsel %vm286_vm10, %v648_v53, %v812_v12 }
 0x5c5   :  { %v828_v15 = vpop.permute.xlu1 %827 }
 0x5ce   :  { %v826_v10 = vpop.permute.xlu0 %825 }
 0x5cf   :  { %v837_v11 = vsel %vm836_vm13, %v834_v9, %v826_v10 }
 0x5d0   :  { %2129 = vmatmul.msk.f32.vlgmr.msra.gmra.mxu1 %vm171_vm2, %v837_v11 }
 0x5e3   :  { %v820_v14 = vpop.permute.xlu0 %819 }
 0x5e4   :  { %v835_v16 = vsel %vm833_vm12, %v832_v13, %v820_v14  ;;  %v1068_v13 = vld [vmem:[%s3185_s13 + $0x38] sm:$0xff] }
 0x5e5   :  { %v838_v17 = vsel %vm836_vm13, %v835_v16, %v828_v15  ;;  %1088 = vmatpush.msrb.mxu3 %v1068_v13  ;;  %v1067_v16 = vld [vmem:[%s3185_s13 + $0x30] sm:$0xff] }
 0x5e6   :  { %2130 = vmatmul.msk.f32.gmra.mxu1 %vm171_vm2, %v838_v17 }
 0x5e7   :  { %1089 = vmatpush.msrb.mxu3 %v1067_v16 }
 0x64d   :  { %v866_v19 = vpop.f32.mrf.mxu1 }
 0x64e   :  { %v872_v20 = vadd.f32 %v866_v19, %v2574_v51  ;;  %v1066_v19 = vld [vmem:[%s3185_s13 + $0x28] sm:$0xff] }
 0x64f   :  { %1090 = vmatpush.msrb.mxu3 %v1066_v19 }
 0x650   :  { %v2777_v21 = vadd.f32 %v2244_v18, %v872_v20 }
 0x652   :  { %v882_v22 = vsel %vm171_vm2, %v2777_v21, 0.0 }
 0x653   :  { %883 = vadd.xlane.f32.xlu2 %v882_v22 }
 0x663   :  { %v869_v23 = vpop.f32.mrf.mxu1 }
 0x664   :  { %v873_v24 = vadd.f32 %v869_v23, %v2578_v54  ;;  %v1065_v23 = vld [vmem:[%s3185_s13 + $0x20] sm:$0xff] }
 0x665   :  { %1091 = vmatpush.msrb.mxu3 %v1065_v23 }
 0x666   :  { %v2782_v25 = vadd.f32 %v2244_v18, %v873_v24 }
 0x668   :  { %v885_v26 = vsel %vm171_vm2, %v2782_v25, 0.0 }
 0x669   :  { %886 = vadd.xlane.f32.xlu0 %v885_v26 }
 0x6c6   :  { %v884_v27 = vpop.xlane.xlu2 %883 }
 0x6c7   :  { %v888_v28 = vmul.f32 %v884_v27, %v2582_v62  ;;  %v1064_v27 = vld [vmem:[%s3185_s13 + $0x18] sm:$0xff] }
 0x6c8   :  { %1092 = vmatpush.msrb.mxu3 %v1064_v27 }
 0x6c9   :  { %v890_v51 = vsub.f32 %v2777_v21, %v888_v28 }
 0x6cb   :  { %v892_v29 = vmul.f32 %v890_v51, %v890_v51 }
 0x6cd   :  { %v894_v30 = vsel %vm171_vm2, %v892_v29, 0.0 }
 0x6ce   :  { %895 = vadd.xlane.f32.xlu1 %v894_v30 }
 0x6dc   :  { %v887_v31 = vpop.xlane.xlu0 %886 }
 0x6dd   :  { %v889_v32 = vmul.f32 %v887_v31, %v2582_v62  ;;  %v1062_v31 = vld [vmem:[%s3185_s13 + $0x8] sm:$0xff] }
 0x6df   :  { %v891_v54 = vsub.f32 %v2782_v25, %v889_v32 }
 0x6e1   :  { %v893_v33 = vmul.f32 %v891_v54, %v891_v54 }
 0x6e3   :  { %v897_v34 = vsel %vm171_vm2, %v893_v33, 0.0  ;;  %v1061_v33 = vld [vmem:[%s3185_s13] sm:$0xff] }
 0x6e4   :  { %898 = vadd.xlane.f32.xlu2 %v897_v34 }
 0x741   :  { %v896_v37 = vpop.xlane.xlu1 %895 }
 0x742   :  { %v900_v49 = vmul.f32 %v896_v37, %v2582_v62 }
 0x744   :  { %v902_v38 = vadd.f32 1e-06, %v900_v49 }
 0x746   :  { %2295 = vrsqrt.f32 %v902_v38  ;;  %vm910_vm15 = vweird.f32 %v902_v38 }
 0x74c   :  { %v2296_v39 = vpop.eup %2295 }
 0x74d   :  { %v905_v41 = vmul.f32 %v2296_v39, %v902_v38  ;;  %vm911_vm14 = vweird.f32 %v2296_v39 }
 0x74e   :  { %vm912_vm0 = vmor %vm910_vm15, %vm911_vm14 }
 0x74f   :  { %v906_v42 = vmul.f32 %v2296_v39, %v905_v41 }
 0x751   :  { %v907_v44 = vmul.f32 0.5, %v906_v42 }
 0x753   :  { %v908_v48 = vsub.f32 1.5, %v907_v44 }
 0x755   :  { %v909_v52 = vmul.f32 %v2296_v39, %v908_v48 }
 0x757   :  { %v913_v57 = vsel %vm912_vm0, %v2296_v39, %v909_v52  ;;  %v899_v58 = vpop.xlane.xlu2 %898 }
 0x758   :  { %v924_v59 = vmul.f32 %v913_v57, %v890_v51  ;;  %v901_v43 = vmul.f32 %v899_v58, %v2582_v62  ;;  %v1063_v51 = vld [vmem:[%s3185_s13 + $0x10] sm:$0xff] }
 0x759   :  { %1093 = vmatpush.msrb.mxu3 %v1063_v51 }
 0x75a   :  { %v929_v60 = vmul.f32 %v2245_v56, %v924_v59  ;;  %v903_v40 = vadd.f32 1e-06, %v901_v43 }
 0x75b   :  { %1094 = vmatpush.msrb.mxu3 %v1062_v31 }
 0x75c   :  { %2297 = vrsqrt.f32 %v903_v40  ;;  %v934_v63 = vadd.f32 %v2246_v46, %v929_v60  ;;  %vm920_vm3 = vweird.f32 %v903_v40 }
 0x75d   :  { %1095 = vmatpush.msrb.mxu3 %v1061_v33 }
 0x75e   :  { %2131 = vmatmul.msk.f32.vlgmr.msrb.gmra.mxu2 %vm171_vm2, %v934_v63 }
 0x762   :  { %v2298_v0 = vpop.eup %2297 }
 0x763   :  { %v915_v1 = vmul.f32 %v2298_v0, %v903_v40  ;;  %vm921_vm1 = vweird.f32 %v2298_v0 }
 0x764   :  { %vm922_vm4 = vmor %vm920_vm3, %vm921_vm1 }
 0x765   :  { %v916_v47 = vmul.f32 %v2298_v0, %v915_v1 }
 0x767   :  { %v917_v53 = vmul.f32 0.5, %v916_v47 }
 0x769   :  { %v918_v2 = vsub.f32 1.5, %v917_v53 }
 0x76b   :  { %v919_v3 = vmul.f32 %v2298_v0, %v918_v2 }
 0x76d   :  { %v923_v55 = vsel %vm922_vm4, %v2298_v0, %v919_v3 }
 0x76e   :  { %v925_v4 = vmul.f32 %v923_v55, %v891_v54 }
 0x770   :  { %v930_v5 = vmul.f32 %v2245_v56, %v925_v4 }
 0x772   :  { %v935_v6 = vadd.f32 %v2246_v46, %v930_v5 }
 0x774   :  { %2132 = vmatmul.msk.f32.gmra.mxu2 %vm171_vm2, %v935_v6 }
 0x7e1   :  { %v967_v8 = vpop.f32.mrf.mxu2 }
 0x7e2   :  { %v2817_v9 = vadd.f32 %v2247_v7, %v967_v8 }
 0x7e4   :  { %v2820_v10 = vmul.f32 0.70710677, %v2817_v9  ;;  %v973_v16 = vmul.f32 0.5, %v2817_v9 }
 0x7e6   :  { %v977_v11 = vmul.f32 %v2820_v10, %v2820_v10 }
 0x7e8   :  { %v978_v12 = vmin.f32 %v977_v11, 16.0 }
 0x7ea   :  { %v979_v14 = vmul.f32 2.1237322e-06, %v978_v12  ;;  %v990_v15 = vmul.f32 3.8918573e-05, %v978_v12 }
 0x7ec   :  { %v980_v17 = vadd.f32 0.00028619796, %v979_v14  ;;  %v991_v18 = vadd.f32 0.001143296, %v990_v15 }
 0x7ee   :  { %v981_v20 = vmul.f32 %v980_v17, %v978_v12  ;;  %v992_v22 = vmul.f32 %v991_v18, %v978_v12 }
 0x7f0   :  { %v982_v24 = vadd.f32 0.0036580483, %v981_v20  ;;  %v993_v26 = vadd.f32 0.014752088, %v992_v22 }
 0x7f2   :  { %v994_v28 = vmul.f32 %v993_v26, %v978_v12  ;;  %v983_v29 = vmul.f32 %v982_v24, %v978_v12 }
 0x7f4   :  { %v995_v30 = vadd.f32 0.112945676, %v994_v28  ;;  %v984_v34 = vadd.f32 0.05243302, %v983_v29 }
 0x7f6   :  { %v996_v32 = vmul.f32 %v995_v30, %v978_v12  ;;  %v985_v37 = vmul.f32 %v984_v34, %v978_v12 }
 0x7f7   :  { %v970_v54 = vpop.f32.mrf.mxu2 }
 0x7f8   :  { %v997_v35 = vadd.f32 0.4994258, %v996_v32  ;;  %v2848_v45 = vadd.f32 %v2247_v7, %v970_v54  ;;  %v986_v41 = vadd.f32 0.18741608, %v985_v37 }
 0x7fa   :  { %v998_v50 = vmul.f32 %v997_v35, %v978_v12  ;;  %v2851_v36 = vmul.f32 0.70710677, %v2848_v45  ;;  %v987_v57 = vmul.f32 %v986_v41, %v978_v12  ;;  %v974_v35 = vmul.f32 0.5, %v2848_v45 }
 0x7fc   :  { %v999_v49 = vadd.f32 1.0, %v998_v50  ;;  %v1017_v38 = vmul.f32 %v2851_v36, %v2851_v36  ;;  %v988_v40 = vadd.f32 1.1283791, %v987_v57 }
 0x7fe   :  { %2299 = vrcp.f32 %v999_v49  ;;  %v1018_v39 = vmin.f32 %v1017_v38, 16.0  ;;  %v1011_v63 = vand.u32 2147483648, %v999_v49  ;;  %v1009_v47 = vand.u32 2147483647, %v999_v49 }
 0x7ff   :  { %vm1005_vm6 = vweird.f32 %v999_v49  ;;  %v989_v5 = vmul.f32 %v988_v40, %v2820_v10  ;;  %v2142_v40 = vld [vmem:[%s3177_s5 + $0x38] sm:$0xff] }
 0x800   :  { %v1019_v42 = vmul.f32 2.1237322e-06, %v1018_v39  ;;  %v1030_v44 = vmul.f32 3.8918573e-05, %v1018_v39  ;;  %v1012_v55 = vor.u32 1.1754944e-38, %v1011_v63  ;;  %vm1010_vm8 = vcmp.eq.f32.partialorder %v1009_v47, 8.507059e+37  ;;  %1191 = vmatpush.msrb.mxu0 %v2142_v40 }
 0x801   :  { %v2141_v63 = vld [vmem:[%s3177_s5 + $0x30] sm:$0xff] }
 0x802   :  { %v1020_v48 = vadd.f32 0.00028619796, %v1019_v42  ;;  %v1031_v52 = vadd.f32 0.001143296, %v1030_v44  ;;  %1192 = vmatpush.msrb.mxu0 %v2141_v63 }
 0x804   :  { %v2300_v56 = vpop.eup %2299  ;;  %v1021_v59 = vmul.f32 %v1020_v48, %v1018_v39  ;;  %v1032_v43 = vmul.f32 %v1031_v52, %v1018_v39 }
 0x805   :  { %v1001_v58 = vmul.f32 %v2300_v56, %v999_v49  ;;  %vm1006_vm5 = vweird.f32 %v2300_v56  ;;  %v2248_v49 = vld [vmem:[%s3184_s14] ss:$0 sm:$0xff] }
 0x806   :  { %v1033_v60 = vadd.f32 0.014752088, %v1032_v43  ;;  %v1022_v0 = vadd.f32 0.0036580483, %v1021_v59  ;;  %vm1007_vm7 = vmor %vm1005_vm6, %vm1006_vm5 }
 0x807   :  { %v1002_v46 = vsub.f32 1.0, %v1001_v58 }
 0x808   :  { %v1034_v53 = vmul.f32 %v1033_v60, %v1018_v39  ;;  %v1023_v4 = vmul.f32 %v1022_v0, %v1018_v39  ;;  %v2140_v0 = vld [vmem:[%s3177_s5 + $0x28] sm:$0xff] }
 0x809   :  { %v1003_v1 = vmul.f32 %v2300_v56, %v1002_v46  ;;  %1193 = vmatpush.msrb.mxu0 %v2140_v0 }
 0x80a   :  { %v1035_v3 = vadd.f32 0.112945676, %v1034_v53  ;;  %v1024_v13 = vadd.f32 0.05243302, %v1023_v4 }
 0x80b   :  { %v1004_v2 = vadd.f32 %v2300_v56, %v1003_v1  ;;  %v2139_v1 = vld [vmem:[%s3177_s5 + $0x20] sm:$0xff] }
 0x80c   :  { %v1036_v7 = vmul.f32 %v1035_v3, %v1018_v39  ;;  %v1025_v19 = vmul.f32 %v1024_v13, %v1018_v39  ;;  %1194 = vmatpush.msrb.mxu0 %v2139_v1 }
 0x80d   :  { %v1008_v6 = vsel %vm1007_vm7, %v2300_v56, %v1004_v2 }
 0x80e   :  { %v1013_v8 = vsel %vm1010_vm8, %v1012_v55, %v1008_v6  ;;  %v1037_v12 = vadd.f32 0.4994258, %v1036_v7  ;;  %v1026_v10 = vadd.f32 0.18741608, %v1025_v19 }
 0x80f   :  { %v1014_v11 = vmul.f32 %v1013_v8, %v989_v5  ;;  %v2241_v8 = vld [vmem:[%s3174_s9 + $0x1] ss:$0 sm:$0xff] }
 0x810   :  { %v1038_v15 = vmul.f32 %v1037_v12, %v1018_v39  ;;  %v1027_v23 = vmul.f32 %v1026_v10, %v1018_v39  ;;  %v2242_v12 = vld [vmem:[%s3175_s10 + $0x1] ss:$0 sm:$0xff] }
 0x811   :  { %v2133_v14 = vclamps-f32 %v1014_v11, 1.0 }
 0x812   :  { %v1039_v18 = vadd.f32 1.0, %v1038_v15  ;;  %v1028_v28 = vadd.f32 1.1283791, %v1027_v23 }
 0x813   :  { %v1057_v17 = vadd.f32 1.0, %v2133_v14 }
 0x814   :  { %2301 = vrcp.f32 %v1039_v18  ;;  %v1051_v27 = vand.u32 2147483648, %v1039_v18  ;;  %v1049_v29 = vand.u32 2147483647, %v1039_v18  ;;  %vm1045_vm15 = vweird.f32 %v1039_v18 }
 0x815   :  { %v1059_v20 = vmul.f32 %v1057_v17, %v973_v16  ;;  %v1029_v31 = vmul.f32 %v1028_v28, %v2851_v36 }
 0x816   :  { %v1052_v9 = vor.u32 1.1754944e-38, %v1051_v27  ;;  %vm1050_vm1 = vcmp.eq.f32.partialorder %v1049_v29, 8.507059e+37  ;;  %v2249_v29 = vld [vmem:[%s3176_s6 + $0x1] ss:$0 sm:$0xff] }
 0x817   :  { %2135 = vmatmul.msk.f32.vlgmr.msrb.gmra.mxu3 %vm1073_vm9, %v1059_v20 }
 0x81a   :  { %v2302_v22 = vpop.eup %2301 }
 0x81b   :  { %v1041_v24 = vmul.f32 %v2302_v22, %v1039_v18  ;;  %vm1046_vm14 = vweird.f32 %v2302_v22 }
 0x81c   :  { %vm1047_vm0 = vmor %vm1045_vm15, %vm1046_vm14 }
 0x81d   :  { %v1042_v26 = vsub.f32 1.0, %v1041_v24 }
 0x81f   :  { %v1043_v51 = vmul.f32 %v2302_v22, %v1042_v26 }
 0x821   :  { %v1044_v30 = vadd.f32 %v2302_v22, %v1043_v51 }
 0x823   :  { %v1048_v32 = vsel %vm1047_vm0, %v2302_v22, %v1044_v30 }
 0x824   :  { %v1053_v54 = vsel %vm1050_vm1, %v1052_v9, %v1048_v32 }
 0x825   :  { %v1054_v33 = vmul.f32 %v1053_v54, %v1029_v31 }
 0x827   :  { %v2134_v34 = vclamps-f32 %v1054_v33, 1.0 }
 0x829   :  { %v1058_v50 = vadd.f32 1.0, %v2134_v34 }
 0x82b   :  { %v1060_v37 = vmul.f32 %v1058_v50, %v974_v35 }
 0x82d   :  { %2136 = vmatmul.msk.f32.gmra.mxu3 %vm1073_vm9, %v1060_v37 }
 0x89a   :  { %v1097_v38 = vpop.f32.mrf.mxu3 }
 0x89b   :  { %v1098_v39 = vadd.f32 %v2248_v49, %v1097_v38 }
 0x89d   :  { %v2865_v41 = vadd.f32 %v1098_v39, %v2777_v21 }
 0x89f   :  { %v1109_v36 = vsel %vm171_vm2, %v2865_v41, 0.0 }
 0x8a0   :  { %1110 = vadd.xlane.f32.xlu0 %v1109_v36 }
 0x8b0   :  { %v1100_v42 = vpop.f32.mrf.mxu3 }
 0x8b1   :  { %v1101_v44 = vadd.f32 %v2248_v49, %v1100_v42 }
 0x8b3   :  { %v2870_v45 = vadd.f32 %v1101_v44, %v2782_v25 }
 0x8b5   :  { %v1112_v48 = vsel %vm171_vm2, %v2870_v45, 0.0 }
 0x8b6   :  { %1113 = vadd.xlane.f32.xlu1 %v1112_v48 }
 0x913   :  { %v1111_v52 = vpop.xlane.xlu0 %1110 }
 0x914   :  { %v1115_v56 = vmul.f32 %v1111_v52, %v2582_v62 }
 0x916   :  { %v1117_v57 = vsub.f32 %v2865_v41, %v1115_v56 }
 0x918   :  { %v1119_v21 = vmul.f32 %v1117_v57, %v1117_v57 }
 0x91a   :  { %v1121_v58 = vsel %vm171_vm2, %v1119_v21, 0.0 }
 0x91b   :  { %1122 = vadd.xlane.f32.xlu2 %v1121_v58 }
 0x929   :  { %v1114_v59 = vpop.xlane.xlu1 %1113 }
 0x92a   :  { %v1116_v43 = vmul.f32 %v1114_v59, %v2582_v62 }
 0x92c   :  { %v1118_v46 = vsub.f32 %v2870_v45, %v1116_v43 }
 0x92e   :  { %v1120_v25 = vmul.f32 %v1118_v46, %v1118_v46 }
 0x930   :  { %v1124_v60 = vsel %vm171_vm2, %v1120_v25, 0.0 }
 0x931   :  { %1125 = vadd.xlane.f32.xlu0 %v1124_v60 }
 0x98e   :  { %v1123_v47 = vpop.xlane.xlu2 %1122 }
 0x98f   :  { %v1127_v53 = vmul.f32 %v1123_v47, %v2582_v62 }
 0x991   :  { %v1129_v2 = vadd.f32 1e-06, %v1127_v53 }
 0x993   :  { %2303 = vrsqrt.f32 %v1129_v2  ;;  %vm1137_vm4 = vweird.f32 %v1129_v2 }
 0x999   :  { %v2304_v3 = vpop.eup %2303 }
 0x99a   :  { %v1132_v55 = vmul.f32 %v2304_v3, %v1129_v2  ;;  %vm1138_vm3 = vweird.f32 %v2304_v3 }
 0x99b   :  { %vm1139_vm5 = vmor %vm1137_vm4, %vm1138_vm3 }
 0x99c   :  { %v1133_v4 = vmul.f32 %v2304_v3, %v1132_v55 }
 0x99e   :  { %v1134_v5 = vmul.f32 0.5, %v1133_v4 }
 0x9a0   :  { %v1135_v6 = vsub.f32 1.5, %v1134_v5 }
 0x9a2   :  { %v1136_v7 = vmul.f32 %v2304_v3, %v1135_v6 }
 0x9a4   :  { %v1140_v11 = vsel %vm1139_vm5, %v2304_v3, %v1136_v7  ;;  %v1126_v14 = vpop.xlane.xlu0 %1125 }
 0x9a5   :  { %v1151_v13 = vmul.f32 %v1140_v11, %v1117_v57  ;;  %v1128_v15 = vmul.f32 %v1126_v14, %v2582_v62 }
 0x9a7   :  { %v1156_v16 = vmul.f32 %v2241_v8, %v1151_v13  ;;  %v1130_v17 = vadd.f32 1e-06, %v1128_v15 }
 0x9a9   :  { %v1161_v18 = vadd.f32 %v2242_v12, %v1156_v16  ;;  %2305 = vrsqrt.f32 %v1130_v17  ;;  %vm1147_vm7 = vweird.f32 %v1130_v17 }
 0x9ab   :  { %2144 = vmatmul.msk.f32.vlgmr.msrb.gmra.mxu0 %vm171_vm2, %v1161_v18 }
 0x9af   :  { %v2306_v19 = vpop.eup %2305 }
 0x9b0   :  { %v1142_v20 = vmul.f32 %v2306_v19, %v1130_v17  ;;  %vm1148_vm6 = vweird.f32 %v2306_v19 }
 0x9b1   :  { %vm1149_vm8 = vmor %vm1147_vm7, %vm1148_vm6 }
 0x9b2   :  { %v1143_v10 = vmul.f32 %v2306_v19, %v1142_v20 }
 0x9b4   :  { %v1144_v22 = vmul.f32 0.5, %v1143_v10 }
 0x9b6   :  { %v1145_v23 = vsub.f32 1.5, %v1144_v22 }
 0x9b8   :  { %v1146_v24 = vmul.f32 %v2306_v19, %v1145_v23 }
 0x9ba   :  { %v1150_v26 = vsel %vm1149_vm8, %v2306_v19, %v1146_v24 }
 0x9bb   :  { %v1152_v27 = vmul.f32 %v1150_v26, %v1118_v46 }
 0x9bd   :  { %v1157_v28 = vmul.f32 %v2241_v8, %v1152_v27 }
 0x9bf   :  { %v1162_v51 = vadd.f32 %v2242_v12, %v1157_v28 }
 0x9c1   :  { %2145 = vmatmul.msk.f32.gmra.mxu0 %vm171_vm2, %v1162_v51 }
 0xa28   :  { %v1196_v30 = vpop.f32.mrf.mxu0 }
 0xa29   :  { %v2905_v9 = vadd.f32 %v2249_v29, %v1196_v30 }
 0xa2b   :  { %1204 = vrot.lane.b32.xlu2 %v2905_v9, %s2352_s23  ;;  %1208 = vrot.lane.b32.xlu1 %v2905_v9, %s2354_s3 }
 0xa3e   :  { %v1199_v31 = vpop.f32.mrf.mxu0 }
 0xa3f   :  { %v2911_v32 = vadd.f32 %v2249_v29, %v1199_v31 }
 0xa41   :  { %1214 = vrot.lane.b32.xlu2 %v2911_v32, %s2353_s24  ;;  %1206 = vrot.lane.b32.xlu1 %v2911_v32, %s2352_s23 }
 0xa42   :  { %1210 = vrot.lane.b32.xlu0 %v2911_v32, %s2354_s3 }
 0xa49   :  { %1242 = vrot.lane.b32.xlu1 %v2911_v32, %s2355_s25 }
 0xa4a   :  { %1212 = vrot.lane.b32.xlu0 %v2905_v9, %s2353_s24 }
 0xa52   :  { %1216 = vrot.lane.b32.xlu0 %v2905_v9, %s2355_s25 }
 0xa85   :  { %v2925_v54 = vpop.permute.xlu2 %1204 }
 0xa86   :  { %1268 = vrot.lane.b32.xlu1 %v2925_v54, %s2355_s25  ;;  %v2223_v51 = vpack.i.bf16 %v2925_v54, %v2905_v9 }
 0xa9b   :  { %v2941_v37 = vpop.permute.xlu2 %1214 }
 0xa9d   :  { %v2929_v33 = vpop.permute.xlu1 %1208 }
 0xa9e   :  { %1320 = vrot.lane.b32.xlu2 %v2929_v33, %s2355_s25 }
 0xab3   :  { %v2933_v34 = vpop.permute.xlu1 %1206 }
 0xab4   :  { %v2935_v35 = vpop.permute.xlu0 %1210  ;;  %1294 = vrot.lane.b32.xlu2 %v2933_v34, %s2355_s25 }
 0xab5   :  { %1346 = vrot.lane.b32.xlu0 %v2935_v35, %s2355_s25 }
 0xabb   :  { %v1243_v50 = vpop.permute.xlu1 %1242 }
 0xabc   :  { %v2943_v49 = vpop.permute.xlu0 %1212  ;;  %2148 = vmatpush.xpose.msk.msra.mxu2 %vm286_vm10, %v1243_v50 }
 0xabd   :  { %1398 = vrot.lane.b32.xlu0 %v2941_v37, %s2355_s25  ;;  %1372 = vrot.lane.b32.xlu1 %v2943_v49, %s2355_s25 }
 0xabf   :  { %2149 = vmatmul.msk.f32.vlgmr.msra.gmra.mxu2 %vm286_vm10, %v2911_v32 }
 0xac4   :  { %v1217_v38 = vpop.permute.xlu0 %1216 }
 0xac5   :  { %2146 = vmatpush.xpose.msk.msrb.mxu1 %vm286_vm10, %v1217_v38 }
 0xac8   :  { %2147 = vmatmul.msk.f32.vlgmr.msrb.gmra.mxu1 %vm286_vm10, %v2905_v9 }
 0xaf8   :  { %v1321_v39 = vpop.permute.xlu2 %1320  ;;  %v1269_v36 = vpop.permute.xlu1 %1268 }
 0xaf9   :  { %2150 = vmatpush.xpose.msk.msra.mxu0 %vm286_vm10, %v1269_v36  ;;  %2154 = vmatpush.xpose.msk.msrb.mxu2 %vm286_vm10, %v1321_v39 }
 0xafc   :  { %2151 = vmatmul.msk.f32.vlgmr.msra.gmra.mxu0 %vm286_vm10, %v2925_v54  ;;  %2155 = vmatmul.msk.f32.vlgmr.msrb.gmra.mxu2 %vm286_vm10, %v2929_v33 }
 0xb0e   :  { %v1295_v42 = vpop.permute.xlu2 %1294 }
 0xb0f   :  { %2152 = vmatpush.xpose.msk.msra.mxu1 %vm286_vm10, %v1295_v42 }
 0xb12   :  { %2153 = vmatmul.msk.f32.vlgmr.msra.gmra.mxu1 %vm286_vm10, %v2933_v34 }
 0xb27   :  { %v1347_v44 = vpop.permute.xlu0 %1346 }
 0xb28   :  { %2156 = vmatpush.xpose.msk.msra.mxu3 %vm286_vm10, %v1347_v44 }
 0xb2b   :  { %2157 = vmatmul.msk.f32.vlgmr.msra.gmra.mxu3 %vm286_vm10, %v2935_v35 }
 0xb2f   :  { %v1373_v48 = vpop.permute.xlu1 %1372  ;;  %v1399_v52 = vpop.permute.xlu0 %1398 }
 0xb30   :  { %2158 = vmatpush.xpose.msk.msrb.mxu0 %vm286_vm10, %v1373_v48  ;;  %2160 = vmatpush.xpose.msk.msrb.mxu1 %vm286_vm10, %v1399_v52 }
 0xb33   :  { %2159 = vmatmul.msk.f32.vlgmr.msrb.gmra.mxu0 %vm286_vm10, %v2943_v49  ;;  %2161 = vmatmul.msk.f32.vlgmr.msrb.gmra.mxu1 %vm286_vm10, %v2941_v37 }
 0xb42   :  { %v1265_v56 = vpop.f32.mrf.mxu2 }
 0xb43   :  { %v1425_v57 = vmul.f32 0.35355338, %v1265_v56 }
 0xb45   :  { %v1239_v21 = vpop.f32.mrf.mxu1  ;;  %v1433_v58 = vsel %vm168_vm11, %v1425_v57, -1e+30 }
 0xb46   :  { %v1424_v59 = vmul.f32 0.35355338, %v1239_v21  ;;  %v1443_v43 = vsel %vm286_vm10, %v1433_v58, -inf  ;;  %v2233_v21 = vpack.i.bf16 %v2943_v49, %v2933_v34 }
 0xb47   :  { %1444 = vmax.xlane.f32.xlu0 %v1443_v43 }
 0xb48   :  { %v1432_v46 = vsel %vm168_vm11, %v1424_v59, -1e+30 }
 0xb49   :  { %v1440_v25 = vsel %vm286_vm10, %v1432_v46, -inf }
 0xb4a   :  { %1441 = vmax.xlane.f32.xlu2 %v1440_v25 }
 0xb79   :  { %v1291_v60 = vpop.f32.mrf.mxu0 }
 0xb7a   :  { %v1426_v40 = vmul.f32 0.35355338, %v1291_v60 }
 0xb7c   :  { %v1434_v63 = vsel %vm168_vm11, %v1426_v40, -1e+30 }
 0xb7d   :  { %v1446_v0 = vsel %vm286_vm10, %v1434_v63, -inf }
 0xb7e   :  { %1447 = vmax.xlane.f32.xlu1 %v1446_v0 }
 0xb7f   :  { %v1343_v1 = vpop.f32.mrf.mxu2 }
 0xb80   :  { %v1428_v47 = vmul.f32 0.35355338, %v1343_v1 }
 0xb82   :  { %v1436_v53 = vsel %vm168_vm11, %v1428_v47, -1e+30 }
 0xb83   :  { %v1452_v2 = vsel %vm286_vm10, %v1436_v53, -inf }
 0xb84   :  { %1453 = vmax.xlane.f32.xlu2 %v1452_v2 }
 0xb8f   :  { %v1317_v3 = vpop.f32.mrf.mxu1 }
 0xb90   :  { %v1427_v55 = vmul.f32 0.35355338, %v1317_v3 }
 0xb92   :  { %v1435_v4 = vsel %vm168_vm11, %v1427_v55, -1e+30 }
 0xb93   :  { %v1449_v5 = vsel %vm286_vm10, %v1435_v4, -inf }
 0xb94   :  { %1450 = vmax.xlane.f32.xlu1 %v1449_v5 }
 0xbae   :  { %v1369_v6 = vpop.f32.mrf.mxu3 }
 0xbaf   :  { %v1429_v7 = vmul.f32 0.35355338, %v1369_v6 }
 0xbb0   :  { %v1395_v8 = vpop.f32.mrf.mxu0  ;;  %v1421_v11 = vpop.f32.mrf.mxu1 }
 0xbb1   :  { %v1430_v12 = vmul.f32 0.35355338, %v1395_v8  ;;  %v1431_v13 = vmul.f32 0.35355338, %v1421_v11  ;;  %v1437_v14 = vsel %vm168_vm11, %v1429_v7, -1e+30  ;;  %v2228_v8 = vpack.i.bf16 %v2929_v33, %v2911_v32 }
 0xbb2   :  { %v1455_v15 = vsel %vm286_vm10, %v1437_v14, -inf }
 0xbb3   :  { %1456 = vmax.xlane.f32.xlu2 %v1455_v15  ;;  %v1438_v16 = vsel %vm168_vm11, %v1430_v12, -1e+30  ;;  %v1439_v17 = vsel %vm168_vm11, %v1431_v13, -1e+30 }
 0xbb4   :  { %v1458_v18 = vsel %vm286_vm10, %v1438_v16, -inf  ;;  %v1461_v19 = vsel %vm286_vm10, %v1439_v17, -inf }
 0xbb5   :  { %1459 = vmax.xlane.f32.xlu0 %v1458_v18  ;;  %1462 = vmax.xlane.f32.xlu1 %v1461_v19 }
 0xbba   :  { %v1445_v20 = vpop.xlane.xlu0 %1444 }
 0xbbb   :  { %v1465_v10 = vsub.f32 %v1433_v58, %v1445_v20 }
 0xbbd   :  { %v1474_v22 = vmul.f32 1.442695, %v1465_v10  ;;  %v1442_v23 = vpop.xlane.xlu2 %1441 }
 0xbbe   :  { %v1464_v24 = vsub.f32 %v1432_v46, %v1442_v23 }
 0xbbf   :  { %2307 = vpow2.f32 %v1474_v22 }
 0xbc0   :  { %v1472_v26 = vmul.f32 1.442695, %v1464_v24 }
 0xbc2   :  { %2309 = vpow2.f32 %v1472_v26 }
 0xbc5   :  { %v2997_v27 = vpop.eup %2307 }
 0xbc6   :  { %v1491_v61 = vsel %vm286_vm10, %v2997_v27, 0.0 }
 0xbc7   :  { %1492 = vadd.xlane.f32.xlu1 %v1491_v61 }
 0xbc8   :  { %v2310_v28 = vpop.eup %2309 }
 0xbc9   :  { %v1488_v29 = vsel %vm286_vm10, %v2310_v28, 0.0 }
 0xbca   :  { %1489 = vadd.xlane.f32.xlu0 %v1488_v29 }
 0xbcb   :  { %2224 = vrot.lane.b32.xlu2 %v2223_v51, %s2356_s4 }
 0xbf1   :  { %v1448_v30 = vpop.xlane.xlu1 %1447 }
 0xbf2   :  { %v1466_v31 = vsub.f32 %v1434_v63, %v1448_v30 }
 0xbf4   :  { %v1476_v50 = vmul.f32 1.442695, %v1466_v31 }
 0xbf6   :  { %2311 = vpow2.f32 %v1476_v50 }
 0xbf7   :  { %v1454_v38 = vpop.xlane.xlu2 %1453 }
 0xbf8   :  { %v1468_v39 = vsub.f32 %v1436_v53, %v1454_v38 }
 0xbfa   :  { %v1480_v36 = vmul.f32 1.442695, %v1468_v39 }
 0xbfc   :  { %v2312_v42 = vpop.eup %2311  ;;  %2313 = vpow2.f32 %v1480_v36 }
 0xbfd   :  { %v1494_v44 = vsel %vm286_vm10, %v2312_v42, 0.0 }
 0xbfe   :  { %1495 = vadd.xlane.f32.xlu2 %v1494_v44 }
 0xc02   :  { %v3006_v48 = vpop.eup %2313 }
 0xc03   :  { %v1500_v9 = vsel %vm286_vm10, %v3006_v48, 0.0 }
 0xc04   :  { %1501 = vadd.xlane.f32.xlu0 %v1500_v9 }
 0xc07   :  { %v1451_v54 = vpop.xlane.xlu1 %1450 }
 0xc08   :  { %v1467_v52 = vsub.f32 %v1435_v4, %v1451_v54 }
 0xc0a   :  { %v1478_v56 = vmul.f32 1.442695, %v1467_v52 }
 0xc0c   :  { %2315 = vpow2.f32 %v1478_v56 }
 0xc12   :  { %v2316_v57 = vpop.eup %2315 }
 0xc13   :  { %v1497_v58 = vsel %vm286_vm10, %v2316_v57, 0.0 }
 0xc14   :  { %1498 = vadd.xlane.f32.xlu1 %v1497_v58  ;;  %v2172_v58 = vld [vmem:[%s3179_s7 + $0x30] sm:$0xff] }
 0xc16   :  { %2234 = vrot.lane.b32.xlu2 %v2233_v21, %s2356_s4  ;;  %v2173_v21 = vld [vmem:[%s3179_s7 + $0x38] sm:$0xff] }
 0xc1e   :  { %1710 = vrot.lane.b32.xlu2 %v2941_v37, %s2356_s4 }
 0xc26   :  { %v1457_v59 = vpop.xlane.xlu2 %1456 }
 0xc27   :  { %v1469_v43 = vsub.f32 %v1437_v14, %v1457_v59  ;;  %v2171_v59 = vld [vmem:[%s3179_s7 + $0x28] sm:$0xff] }
 0xc28   :  { %v1463_v46 = vpop.xlane.xlu1 %1462  ;;  %v1460_v25 = vpop.xlane.xlu0 %1459 }
 0xc29   :  { %v1482_v60 = vmul.f32 1.442695, %v1469_v43  ;;  %v1471_v40 = vsub.f32 %v1439_v17, %v1463_v46  ;;  %v1470_v63 = vsub.f32 %v1438_v16, %v1460_v25  ;;  %v2170_v43 = vld [vmem:[%s3179_s7 + $0x20] sm:$0xff] }
 0xc2b   :  { %2317 = vpow2.f32 %v1482_v60  ;;  %v1484_v0 = vmul.f32 1.442695, %v1470_v63  ;;  %v1486_v1 = vmul.f32 1.442695, %v1471_v40 }
 0xc2d   :  { %2319 = vpow2.f32 %v1484_v0 }
 0xc2e   :  { %v2225_v34 = vpop.permute.xlu2 %2224  ;;  %2321 = vpow2.f32 %v1486_v1 }
 0xc2f   :  { %v2227_v49 = vunpack.i.h.bf16 %v2225_v34  ;;  %v2226_v47 = vunpack.i.l.bf16 %v2225_v34 }
 0xc31   :  { %v3016_v53 = vpop.eup %2317  ;;  %1549 = vmatpush.msra.mxu2 %v2226_v47  ;;  %1601 = vmatpush.msra.mxu0 %v2227_v49 }
 0xc32   :  { %v1503_v37 = vsel %vm286_vm10, %v3016_v53, 0.0 }
 0xc33   :  { %1504 = vadd.xlane.f32.xlu1 %v1503_v37  ;;  %v2320_v2 = vpop.eup %2319 }
 0xc34   :  { %v1506_v3 = vsel %vm286_vm10, %v2320_v2, 0.0  ;;  %v2322_v55 = vpop.eup %2321 }
 0xc35   :  { %1507 = vadd.xlane.f32.xlu0 %v1506_v3  ;;  %v1509_v4 = vsel %vm286_vm10, %v2322_v55, 0.0 }
 0xc3a   :  { %v1493_v17 = vpop.xlane.xlu1 %1492 }
 0xc3b   :  { %1510 = vadd.xlane.f32.xlu1 %v1509_v4 }
 0xc3d   :  { %v1490_v5 = vpop.xlane.xlu0 %1489 }
 0xc3e   :  { %2323 = vrcp.f32 %v1490_v5 }
 0xc44   :  { %v2324_v6 = vpop.eup %2323 }
 0xc45   :  { %v1520_v7 = vmul.f32 %v2324_v6, %v2310_v28 }
 0xc47   :  { %2162 = vmatmul.msk.f32.vlgmr.msra.gmra.mxu2 %vm286_vm10, %v1520_v7 }
 0xc49   :  { %2229 = vrot.lane.b32.xlu0 %v2228_v8, %s2356_s4 }
 0xc54   :  { %1658 = vrot.lane.b32.xlu1 %v2935_v35, %s2356_s4 }
 0xc71   :  { %v1496_v11 = vpop.xlane.xlu2 %1495 }
 0xc72   :  { %2325 = vrcp.f32 %v1496_v11 }
 0xc77   :  { %v1502_v35 = vpop.xlane.xlu0 %1501 }
 0xc78   :  { %v2326_v12 = vpop.eup %2325 }
 0xc79   :  { %v1522_v13 = vmul.f32 %v2326_v12, %v2312_v42  ;;  %v2235_v14 = vpop.permute.xlu2 %2234 }
 0xc7a   :  { %v2237_v15 = vunpack.i.h.bf16 %v2235_v14  ;;  %v2236_v16 = vunpack.i.l.bf16 %v2235_v14 }
 0xc7b   :  { %2164 = vmatmul.msk.f32.vlgmr.msra.gmra.mxu0 %vm286_vm10, %v1522_v13 }
 0xc7c   :  { %1627 = vmatpush.msra.mxu1 %v2236_v16  ;;  %1705 = vmatpush.msrb.mxu0 %v2237_v15 }
 0xc81   :  { %v1711_v18 = vpop.permute.xlu2 %1710 }
 0xc82   :  { %1731 = vmatpush.msrb.mxu1 %v1711_v18 }
 0xc87   :  { %v1499_v32 = vpop.xlane.xlu1 %1498 }
 0xc88   :  { %2327 = vrcp.f32 %v1499_v32 }
 0xc8e   :  { %v2328_v33 = vpop.eup %2327 }
 0xc8f   :  { %v1523_v19 = vmul.f32 %v2328_v33, %v2316_v57  ;;  %v2182_v33 = vld [vmem:[%s3183_s11 + $0x38] sm:$0xff] }
 0xc91   :  { %2165 = vmatmul.msk.f32.vlgmr.msra.gmra.mxu1 %vm286_vm10, %v1523_v19  ;;  %v2181_v19 = vld [vmem:[%s3183_s11 + $0x30] sm:$0xff] }
 0xca6   :  { %v1505_v20 = vpop.xlane.xlu1 %1504 }
 0xca8   :  { %v1508_v10 = vpop.xlane.xlu0 %1507 }
 0xca9   :  { %2329 = vrcp.f32 %v1508_v10 }
 0xcae   :  { %v1511_v22 = vpop.xlane.xlu1 %1510 }
 0xcaf   :  { %2331 = vrcp.f32 %v1511_v22  ;;  %v2330_v23 = vpop.eup %2329 }
 0xcb0   :  { %v1526_v24 = vmul.f32 %v2330_v23, %v2320_v2  ;;  %2333 = vrcp.f32 %v1493_v17  ;;  %v2250_v2 = vld [vmem:[%s3178_s8 + $0x1] ss:$0 sm:$0xff] }
 0xcb1   :  { %2335 = vrcp.f32 %v1502_v35  ;;  %v2180_v35 = vld [vmem:[%s3183_s11 + $0x28] sm:$0xff] }
 0xcb2   :  { %2168 = vmatmul.msk.f32.vlgmr.msrb.gmra.mxu0 %vm286_vm10, %v1526_v24  ;;  %2337 = vrcp.f32 %v1505_v20  ;;  %v2179_v20 = vld [vmem:[%s3183_s11 + $0x20] sm:$0xff] }
 0xcb5   :  { %v2332_v26 = vpop.eup %2331 }
 0xcb6   :  { %v1527_v61 = vmul.f32 %v2332_v26, %v2322_v55  ;;  %v2334_v28 = vpop.eup %2333 }
 0xcb7   :  { %v2336_v51 = vpop.eup %2335  ;;  %v1521_v50 = vmul.f32 %v2334_v28, %v2997_v27 }
 0xcb8   :  { %2169 = vmatmul.msk.f32.vlgmr.msrb.gmra.mxu1 %vm286_vm10, %v1527_v61  ;;  %v1524_v38 = vmul.f32 %v2336_v51, %v3006_v48  ;;  %v2338_v39 = vpop.eup %2337 }
 0xcb9   :  { %v1525_v36 = vmul.f32 %v2338_v39, %v3016_v53 }
 0xcbb   :  { %v2230_v29 = vpop.permute.xlu0 %2229 }
 0xcbc   :  { %v2232_v30 = vunpack.i.h.bf16 %v2230_v29  ;;  %v2231_v31 = vunpack.i.l.bf16 %v2230_v29 }
 0xcbe   :  { %1575 = vmatpush.msrb.mxu3 %v2231_v31  ;;  %1653 = vmatpush.msrb.mxu2 %v2232_v30  ;;  %v2251_v30 = vld [vmem:[%s3180_s15 + $0x1] ss:$0 sm:$0xff] }
 0xcbf   :  { %2163 = vmatmul.msk.f32.vlgmr.msrb.gmra.mxu3 %vm286_vm10, %v1521_v50  ;;  %2166 = vmatmul.msk.f32.vlgmr.msrb.gmra.mxu2 %vm286_vm10, %v1524_v38  ;;  %v2252_v38 = vld [vmem:[%s3181_s16 + $0x1] ss:$0 sm:$0xff] }
 0xcc0   :  { %1789 = vmatpush.msra.mxu2 %v2173_v21 }
 0xcc2   :  { %1790 = vmatpush.msra.mxu2 %v2172_v58 }
 0xcc4   :  { %1791 = vmatpush.msra.mxu2 %v2171_v59 }
 0xcc6   :  { %v1659_v42 = vpop.permute.xlu1 %1658  ;;  %1792 = vmatpush.msra.mxu2 %v2170_v43 }
 0xcc7   :  { %1679 = vmatpush.msra.mxu3 %v1659_v42 }
 0xcc8   :  { %2167 = vmatmul.msk.f32.vlgmr.msra.gmra.mxu3 %vm286_vm10, %v1525_v36 }
 0xcc9   :  { %1895 = vmatpush.msrb.mxu3 %v2182_v33 }
 0xcca   :  { %v1551_v54 = vpop.f32.mrf.mxu2 }
 0xccb   :  { %1896 = vmatpush.msrb.mxu3 %v2181_v19 }
 0xccd   :  { %1897 = vmatpush.msrb.mxu3 %v2180_v35 }
 0xccf   :  { %1898 = vmatpush.msrb.mxu3 %v2179_v20 }
 0xcf8   :  { %v1603_v44 = vpop.f32.mrf.mxu0 }
 0xcf9   :  { %1738 = vrot.lane.b32.xlu0 %v1603_v44, %s2357_s26 }
 0xd0e   :  { %v1629_v9 = vpop.f32.mrf.mxu1 }
 0xd2f   :  { %v1707_v27 = vpop.f32.mrf.mxu0 }
 0xd30   :  { %1754 = vrot.lane.b32.xlu0 %v1707_v27, %s2359_s28 }
 0xd35   :  { %v1733_v48 = vpop.f32.mrf.mxu1 }
 0xd36   :  { %1756 = vrot.lane.b32.xlu1 %v1733_v48, %s2359_s28 }
 0xd42   :  { %v1577_v52 = vpop.f32.mrf.mxu3  ;;  %v1655_v56 = vpop.f32.mrf.mxu2 }
 0xd43   :  { %1746 = vrot.lane.b32.xlu2 %v1655_v56, %s2358_s27 }
 0xd4b   :  { %v1681_v57 = vpop.f32.mrf.mxu3  ;;  %1740 = vrot.lane.b32.xlu2 %v1629_v9, %s2357_s26 }
 0xd4c   :  { %1748 = vrot.lane.b32.xlu0 %v1681_v57, %s2358_s27 }
 0xd6b   :  { %v1739_v46 = vpop.permute.xlu0 %1738 }
 0xd6c   :  { %v1760_v60 = vsel %vm286_vm10, %v1551_v54, %v1739_v46  ;;  %v2253_v46 = vld [vmem:[%s3182_s12 + $0x1] ss:$0 sm:$0xff] }
 0xd9d   :  { %v1747_v25 = vpop.permute.xlu2 %1746 }
 0xd9e   :  { %v1762_v40 = vsel %vm833_vm12, %v1760_v60, %v1747_v25 }
 0xda2   :  { %v1755_v63 = vpop.permute.xlu0 %1754 }
 0xda3   :  { %v1764_v0 = vsel %vm836_vm13, %v1762_v40, %v1755_v63 }
 0xda4   :  { %2174 = vmatmul.msk.f32.vlgmr.msra.gmra.mxu2 %vm171_vm2, %v1764_v0 }
 0xda5   :  { %v1741_v1 = vpop.permute.xlu2 %1740 }
 0xda6   :  { %v1761_v34 = vsel %vm286_vm10, %v1577_v52, %v1741_v1  ;;  %v2195_v1 = vld [vmem:[%s3185_s13 + $0x78] sm:$0xff] }
 0xda7   :  { %2022 = vmatpush.msra.mxu0 %v2195_v1 }
 0xda8   :  { %v1757_v47 = vpop.permute.xlu1 %1756 }
 0xdbe   :  { %v1749_v49 = vpop.permute.xlu0 %1748 }
 0xdbf   :  { %v1763_v53 = vsel %vm833_vm12, %v1761_v34, %v1749_v49 }
 0xdc0   :  { %v1765_v37 = vsel %vm836_vm13, %v1763_v53, %v1757_v47  ;;  %v2194_v47 = vld [vmem:[%s3185_s13 + $0x70] sm:$0xff] }
 0xdc1   :  { %2175 = vmatmul.msk.f32.gmra.mxu2 %vm171_vm2, %v1765_v37  ;;  %2023 = vmatpush.msra.mxu0 %v2194_v47 }
 0xe27   :  { %v1794_v3 = vpop.f32.mrf.mxu2 }
 0xe28   :  { %v1800_v55 = vadd.f32 %v1794_v3, %v2865_v41 }
 0xe2a   :  { %v3068_v4 = vadd.f32 %v2250_v2, %v1800_v55 }
 0xe2c   :  { %v1813_v5 = vsel %vm171_vm2, %v3068_v4, 0.0 }
 0xe2d   :  { %1814 = vadd.xlane.f32.xlu2 %v1813_v5  ;;  %v2192_v5 = vld [vmem:[%s3185_s13 + $0x60] sm:$0xff] }
 0xe44   :  { %v1797_v6 = vpop.f32.mrf.mxu2 }
 0xe45   :  { %v1801_v7 = vadd.f32 %v1797_v6, %v2870_v45 }
 0xe47   :  { %v3073_v8 = vadd.f32 %v2250_v2, %v1801_v7  ;;  %v2193_v2 = vld [vmem:[%s3185_s13 + $0x68] sm:$0xff] }
 0xe48   :  { %2024 = vmatpush.msra.mxu0 %v2193_v2 }
 0xe49   :  { %v1816_v11 = vsel %vm171_vm2, %v3073_v8, 0.0 }
 0xe4a   :  { %1817 = vadd.xlane.f32.xlu0 %v1816_v11  ;;  %2025 = vmatpush.msra.mxu0 %v2192_v5  ;;  %v2191_v11 = vld [vmem:[%s3185_s13 + $0x58] sm:$0xff] }
 0xe4c   :  { %2026 = vmatpush.msra.mxu0 %v2191_v11 }
 0xea0   :  { %v1815_v12 = vpop.xlane.xlu2 %1814 }
 0xea1   :  { %v1819_v13 = vmul.f32 %v1815_v12, %v2582_v62 }
 0xea3   :  { %v1821_v41 = vsub.f32 %v3068_v4, %v1819_v13  ;;  %v2190_v13 = vld [vmem:[%s3185_s13 + $0x50] sm:$0xff] }
 0xea4   :  { %2027 = vmatpush.msra.mxu0 %v2190_v13 }
 0xea5   :  { %v1823_v14 = vmul.f32 %v1821_v41, %v1821_v41 }
 0xea7   :  { %v1825_v15 = vsel %vm171_vm2, %v1823_v14, 0.0 }
 0xea8   :  { %1826 = vadd.xlane.f32.xlu1 %v1825_v15  ;;  %v2189_v15 = vld [vmem:[%s3185_s13 + $0x48] sm:$0xff] }
 0xea9   :  { %2028 = vmatpush.msra.mxu0 %v2189_v15 }
 0xebd   :  { %v1818_v16 = vpop.xlane.xlu0 %1817 }
 0xebe   :  { %v1820_v17 = vmul.f32 %v1818_v16, %v2582_v62 }
 0xec0   :  { %v1822_v45 = vsub.f32 %v3073_v8, %v1820_v17  ;;  %v2188_v17 = vld [vmem:[%s3185_s13 + $0x40] sm:$0xff] }
 0xec1   :  { %2029 = vmatpush.msra.mxu0 %v2188_v17 }
 0xec2   :  { %v1824_v18 = vmul.f32 %v1822_v45, %v1822_v45 }
 0xec4   :  { %v1828_v32 = vsel %vm171_vm2, %v1824_v18, 0.0 }
 0xec5   :  { %1829 = vadd.xlane.f32.xlu2 %v1828_v32 }
 0xf1b   :  { %v1827_v10 = vpop.xlane.xlu1 %1826 }
 0xf1c   :  { %v1831_v22 = vmul.f32 %v1827_v10, %v2582_v62 }
 0xf1e   :  { %v1833_v23 = vadd.f32 1e-06, %v1831_v22 }
 0xf20   :  { %2339 = vrsqrt.f32 %v1833_v23  ;;  %vm1841_vm11 = vweird.f32 %v1833_v23 }
 0xf26   :  { %v2340_v24 = vpop.eup %2339 }
 0xf27   :  { %v1836_v26 = vmul.f32 %v2340_v24, %v1833_v23  ;;  %vm1842_vm10 = vweird.f32 %v2340_v24 }
 0xf28   :  { %vm1843_vm12 = vmor %vm1841_vm11, %vm1842_vm10 }
 0xf29   :  { %v1837_v61 = vmul.f32 %v2340_v24, %v1836_v26 }
 0xf2b   :  { %v1838_v28 = vmul.f32 0.5, %v1837_v61 }
 0xf2d   :  { %v1839_v51 = vsub.f32 1.5, %v1838_v28 }
 0xf2f   :  { %v1840_v29 = vmul.f32 %v2340_v24, %v1839_v51 }
 0xf31   :  { %v1844_v31 = vsel %vm1843_vm12, %v2340_v24, %v1840_v29 }
 0xf32   :  { %v1855_v50 = vmul.f32 %v1844_v31, %v1821_v41 }
 0xf34   :  { %v1860_v39 = vmul.f32 %v2251_v30, %v1855_v50 }
 0xf36   :  { %v1865_v36 = vadd.f32 %v2252_v38, %v1860_v39 }
 0xf38   :  { %v1830_v42 = vpop.xlane.xlu2 %1829  ;;  %2184 = vmatmul.msk.f32.vlgmr.msrb.gmra.mxu3 %vm171_vm2, %v1865_v36 }
 0xf39   :  { %v1832_v44 = vmul.f32 %v1830_v42, %v2582_v62 }
 0xf3b   :  { %v1834_v9 = vadd.f32 1e-06, %v1832_v44 }
 0xf3d   :  { %2341 = vrsqrt.f32 %v1834_v9  ;;  %vm1851_vm14 = vweird.f32 %v1834_v9 }
 0xf43   :  { %v2342_v27 = vpop.eup %2341 }
 0xf44   :  { %v1846_v48 = vmul.f32 %v2342_v27, %v1834_v9  ;;  %vm1852_vm13 = vweird.f32 %v2342_v27 }
 0xf45   :  { %vm1853_vm15 = vmor %vm1851_vm14, %vm1852_vm13 }
 0xf46   :  { %v1847_v54 = vmul.f32 %v2342_v27, %v1846_v48 }
 0xf48   :  { %v1848_v52 = vmul.f32 0.5, %v1847_v54 }
 0xf4a   :  { %v1849_v56 = vsub.f32 1.5, %v1848_v52 }
 0xf4c   :  { %v1850_v57 = vmul.f32 %v2342_v27, %v1849_v56 }
 0xf4e   :  { %v1854_v21 = vsel %vm1853_vm15, %v2342_v27, %v1850_v57 }
 0xf4f   :  { %v1856_v58 = vmul.f32 %v1854_v21, %v1822_v45 }
 0xf51   :  { %v1861_v59 = vmul.f32 %v2251_v30, %v1856_v58 }
 0xf53   :  { %v1866_v43 = vadd.f32 %v2252_v38, %v1861_v59 }
 0xf55   :  { %2185 = vmatmul.msk.f32.gmra.mxu3 %vm171_vm2, %v1866_v43 }
 0xfbb   :  { %v1900_v25 = vpop.f32.mrf.mxu3 }
 0xfbc   :  { %v3108_v60 = vadd.f32 %v2253_v46, %v1900_v25 }
 0xfbe   :  { %v1908_v40 = vmul.f32 0.70710677, %v3108_v60 }
 0xfc0   :  { %v1910_v63 = vmul.f32 %v1908_v40, %v1908_v40 }
 0xfc2   :  { %v1911_v0 = vmin.f32 %v1910_v63, 16.0  ;;  %v1906_v63 = vmul.f32 0.5, %v3108_v60 }
 0xfc4   :  { %v1912_v34 = vmul.f32 2.1237322e-06, %v1911_v0  ;;  %v1923_v49 = vmul.f32 3.8918573e-05, %v1911_v0 }
 0xfc6   :  { %v1913_v53 = vadd.f32 0.00028619796, %v1912_v34  ;;  %v1924_v37 = vadd.f32 0.001143296, %v1923_v49 }
 0xfc8   :  { %v1914_v3 = vmul.f32 %v1913_v53, %v1911_v0  ;;  %v1925_v55 = vmul.f32 %v1924_v37, %v1911_v0 }
 0xfca   :  { %v1915_v6 = vadd.f32 0.0036580483, %v1914_v3  ;;  %v1926_v7 = vadd.f32 0.014752088, %v1925_v55 }
 0xfcc   :  { %v1927_v12 = vmul.f32 %v1926_v7, %v1911_v0  ;;  %v1916_v41 = vmul.f32 %v1915_v6, %v1911_v0 }
 0xfce   :  { %v1928_v14 = vadd.f32 0.112945676, %v1927_v12  ;;  %v1917_v45 = vadd.f32 0.05243302, %v1916_v41 }
 0xfd0   :  { %v1929_v16 = vmul.f32 %v1928_v14, %v1911_v0  ;;  %v1918_v33 = vmul.f32 %v1917_v45, %v1911_v0 }
 0xfd2   :  { %v1930_v18 = vadd.f32 0.4994258, %v1929_v16  ;;  %v1919_v10 = vadd.f32 0.18741608, %v1918_v33 }
 0xfd4   :  { %v1931_v32 = vmul.f32 %v1930_v18, %v1911_v0  ;;  %v1920_v26 = vmul.f32 %v1919_v10, %v1911_v0 }
 0xfd6   :  { %v1932_v19 = vadd.f32 1.0, %v1931_v32  ;;  %v1921_v31 = vadd.f32 1.1283791, %v1920_v26 }
 0xfd8   :  { %v1903_v35 = vpop.f32.mrf.mxu3  ;;  %2343 = vrcp.f32 %v1932_v19  ;;  %v1942_v50 = vand.u32 2147483647, %v1932_v19  ;;  %v1944_v38 = vand.u32 2147483648, %v1932_v19  ;;  %vm1938_vm1 = vweird.f32 %v1932_v19 }
 0xfd9   :  { %v3135_v20 = vadd.f32 %v2253_v46, %v1903_v35  ;;  %v1922_v54 = vmul.f32 %v1921_v31, %v1908_v40 }
 0xfda   :  { %v1945_v48 = vor.u32 1.1754944e-38, %v1944_v38  ;;  %vm1943_vm4 = vcmp.eq.f32.partialorder %v1942_v50, 8.507059e+37 }
 0xfdb   :  { %v1909_v22 = vmul.f32 0.70710677, %v3135_v20  ;;  %v1907_v18 = vmul.f32 0.5, %v3135_v20 }
 0xfdd   :  { %v1950_v23 = vmul.f32 %v1909_v22, %v1909_v22 }
 0xfde   :  { %v2344_v24 = vpop.eup %2343 }
 0xfdf   :  { %v1934_v61 = vmul.f32 %v2344_v24, %v1932_v19  ;;  %v1951_v28 = vmin.f32 %v1950_v23, 16.0  ;;  %vm1939_vm0 = vweird.f32 %v2344_v24  ;;  %v2254_v19 = vld [vmem:[%s3184_s14 + $0x1] ss:$0 sm:$0xff] }
 0xfe0   :  { %vm1940_vm3 = vmor %vm1938_vm1, %vm1939_vm0 }
 0xfe1   :  { %v1935_v51 = vsub.f32 1.0, %v1934_v61  ;;  %v1952_v29 = vmul.f32 2.1237322e-06, %v1951_v28  ;;  %v1963_v30 = vmul.f32 3.8918573e-05, %v1951_v28 }
 0xfe3   :  { %v1936_v39 = vmul.f32 %v2344_v24, %v1935_v51  ;;  %v1953_v36 = vadd.f32 0.00028619796, %v1952_v29  ;;  %v1964_v42 = vadd.f32 0.001143296, %v1963_v30 }
 0xfe5   :  { %v1937_v44 = vadd.f32 %v2344_v24, %v1936_v39  ;;  %v1954_v9 = vmul.f32 %v1953_v36, %v1951_v28  ;;  %v1965_v27 = vmul.f32 %v1964_v42, %v1951_v28 }
 0xfe7   :  { %v1941_v52 = vsel %vm1940_vm3, %v2344_v24, %v1937_v44  ;;  %v1966_v56 = vadd.f32 0.014752088, %v1965_v27  ;;  %v1955_v21 = vadd.f32 0.0036580483, %v1954_v9 }
 0xfe8   :  { %v1946_v57 = vsel %vm1943_vm4, %v1945_v48, %v1941_v52 }
 0xfe9   :  { %v1947_v58 = vmul.f32 %v1946_v57, %v1922_v54  ;;  %v1967_v59 = vmul.f32 %v1966_v56, %v1951_v28  ;;  %v1956_v25 = vmul.f32 %v1955_v21, %v1951_v28  ;;  %v2255_v57 = vld [vmem:[%s3186_s17] ss:$0 sm:$0xff] }
 0xfeb   :  { %v2186_v43 = vclamps-f32 %v1947_v58, 1.0  ;;  %v1968_v46 = vadd.f32 0.112945676, %v1967_v59  ;;  %v1957_v47 = vadd.f32 0.05243302, %v1956_v25 }
 0xfec   :  { %v2256_v58 = vld [vmem:[%s3187_s18] ss:$0 sm:$0xff] }
 0xfed   :  { %v1990_v0 = vadd.f32 1.0, %v2186_v43  ;;  %v1969_v1 = vmul.f32 %v1968_v46, %v1951_v28  ;;  %v1958_v37 = vmul.f32 %v1957_v47, %v1951_v28 }
 0xfef   :  { %v1992_v34 = vmul.f32 %v1990_v0, %v1906_v63  ;;  %v1970_v49 = vadd.f32 0.4994258, %v1969_v1  ;;  %v1959_v2 = vadd.f32 0.18741608, %v1958_v37 }
 0xff1   :  { %v1971_v53 = vmul.f32 %v1970_v49, %v1951_v28  ;;  %2197 = vmatmul.msk.f32.vlgmr.msra.gmra.mxu0 %vm1073_vm9, %v1992_v34  ;;  %v1960_v55 = vmul.f32 %v1959_v2, %v1951_v28 }
 0xff3   :  { %v1972_v40 = vadd.f32 1.0, %v1971_v53  ;;  %v1961_v11 = vadd.f32 1.1283791, %v1960_v55 }
 0xff5   :  { %2345 = vrcp.f32 %v1972_v40  ;;  %v1984_v7 = vand.u32 2147483648, %v1972_v40  ;;  %v1982_v60 = vand.u32 2147483647, %v1972_v40  ;;  %vm1978_vm6 = vweird.f32 %v1972_v40 }
 0xff6   :  { %v1962_v14 = vmul.f32 %v1961_v11, %v1909_v22 }
 0xff7   :  { %v1985_v41 = vor.u32 1.1754944e-38, %v1984_v7  ;;  %vm1983_vm8 = vcmp.eq.f32.partialorder %v1982_v60, 8.507059e+37 }
 0xffb   :  { %v2346_v3 = vpop.eup %2345 }
 0xffc   :  { %v1974_v5 = vmul.f32 %v2346_v3, %v1972_v40  ;;  %vm1979_vm5 = vweird.f32 %v2346_v3 }
 0xffd   :  { %vm1980_vm7 = vmor %vm1978_vm6, %vm1979_vm5 }
 0xffe   :  { %v1975_v6 = vsub.f32 1.0, %v1974_v5 }
0x1000   :  { %v1976_v12 = vmul.f32 %v2346_v3, %v1975_v6 }
0x1002   :  { %v1977_v13 = vadd.f32 %v2346_v3, %v1976_v12 }
0x1004   :  { %v1981_v15 = vsel %vm1980_vm7, %v2346_v3, %v1977_v13 }
0x1005   :  { %v1986_v16 = vsel %vm1983_vm8, %v1985_v41, %v1981_v15 }
0x1006   :  { %v1987_v17 = vmul.f32 %v1986_v16, %v1962_v14 }
0x1008   :  { %v2187_v45 = vclamps-f32 %v1987_v17, 1.0 }
0x100a   :  { %v1991_v32 = vadd.f32 1.0, %v2187_v45 }
0x100c   :  { %v1993_v33 = vmul.f32 %v1991_v32, %v1907_v18 }
0x100e   :  { %2198 = vmatmul.msk.f32.gmra.mxu0 %vm1073_vm9, %v1993_v33 }
0x106e   :  { %v2031_v35 = vpop.f32.mrf.mxu0 }
0x106f   :  { %v2032_v10 = vadd.f32 %v2254_v19, %v2031_v35 }
0x1071   :  { %v2037_v23 = vadd.f32 %v2032_v10, %v3068_v4 }
0x1073   :  { %v2041_v22 = vsel %vm171_vm2, %v2037_v23, 0.0 }
0x1074   :  { %2042 = vadd.xlane.f32.xlu0 %v2041_v22 }
0x108b   :  { %v2034_v24 = vpop.f32.mrf.mxu0 }
0x108c   :  { %v2035_v26 = vadd.f32 %v2254_v19, %v2034_v24 }
0x108e   :  { %v2038_v61 = vadd.f32 %v2035_v26, %v3073_v8 }
0x1090   :  { %v2044_v20 = vsel %vm171_vm2, %v2038_v61, 0.0 }
0x1091   :  { %2045 = vadd.xlane.f32.xlu1 %v2044_v20 }
0x10e7   :  { %v2043_v28 = vpop.xlane.xlu0 %2042 }
0x10e8   :  { %v2047_v51 = vmul.f32 %v2043_v28, %v2582_v62 }
0x10ea   :  { %v2049_v29 = vsub.f32 %v2037_v23, %v2047_v51 }
0x10ec   :  { %v2051_v30 = vmul.f32 %v2049_v29, %v2049_v29 }
0x10ee   :  { %v2053_v31 = vsel %vm171_vm2, %v2051_v30, 0.0 }
0x10ef   :  { %2054 = vadd.xlane.f32.xlu2 %v2053_v31 }
0x1104   :  { %v2046_v50 = vpop.xlane.xlu1 %2045 }
0x1105   :  { %v2048_v4 = vmul.f32 %v2046_v50, %v2582_v62 }
0x1107   :  { %v2050_v38 = vsub.f32 %v2038_v61, %v2048_v4 }
0x1109   :  { %v2052_v39 = vmul.f32 %v2050_v38, %v2050_v38 }
0x110b   :  { %v2056_v36 = vsel %vm171_vm2, %v2052_v39, 0.0 }
0x110c   :  { %2057 = vadd.xlane.f32.xlu0 %v2056_v36 }
0x1162   :  { %v2055_v8 = vpop.xlane.xlu2 %2054 }
0x1163   :  { %v2059_v42 = vmul.f32 %v2055_v8, %v2582_v62 }
0x1165   :  { %v2061_v44 = vadd.f32 1e-06, %v2059_v42 }
0x1167   :  { %2347 = vrsqrt.f32 %v2061_v44  ;;  %vm2069_vm10 = vweird.f32 %v2061_v44 }
0x116d   :  { %v2348_v9 = vpop.eup %2347 }
0x116e   :  { %v2064_v27 = vmul.f32 %v2348_v9, %v2061_v44  ;;  %vm2070_vm9 = vweird.f32 %v2348_v9 }
0x116f   :  { %vm2071_vm11 = vmor %vm2069_vm10, %vm2070_vm9 }
0x1170   :  { %v2065_v48 = vmul.f32 %v2348_v9, %v2064_v27 }
0x1172   :  { %v2066_v54 = vmul.f32 0.5, %v2065_v48 }
0x1174   :  { %v2067_v52 = vsub.f32 1.5, %v2066_v54 }
0x1176   :  { %v2068_v56 = vmul.f32 %v2348_v9, %v2067_v52 }
0x1178   :  { %v2072_v21 = vsel %vm2071_vm11, %v2348_v9, %v2068_v56 }
0x1179   :  { %v2083_v59 = vmul.f32 %v2072_v21, %v2049_v29 }
0x117b   :  { %v2088_v43 = vmul.f32 %v2255_v57, %v2083_v59 }
0x117d   :  { %v2093_v46 = vadd.f32 %v2256_v58, %v2088_v43 }
0x117f   :  { %v2095_v25 = vsel %vm171_vm2, %v2093_v46, 0.0  ;;  %v2058_v63 = vpop.xlane.xlu0 %2057 }
0x1180   :  { %2097 = vst [vmem:[%s3188_s19] sm:$0xff] %v2095_v25  ;;  %v2060_v0 = vmul.f32 %v2058_v63, %v2582_v62 }
0x1182   :  { %v2062_v1 = vadd.f32 1e-06, %v2060_v0 }
0x1184   :  { %2349 = vrsqrt.f32 %v2062_v1  ;;  %vm2079_vm13 = vweird.f32 %v2062_v1 }
0x118a   :  { %v2350_v34 = vpop.eup %2349 }
0x118b   :  { %v2074_v49 = vmul.f32 %v2350_v34, %v2062_v1  ;;  %vm2080_vm12 = vweird.f32 %v2350_v34 }
0x118c   :  { %vm2081_vm14 = vmor %vm2079_vm13, %vm2080_vm12 }
0x118d   :  { %v2075_v47 = vmul.f32 %v2350_v34, %v2074_v49 }
0x118f   :  { %v2076_v53 = vmul.f32 0.5, %v2075_v47 }
0x1191   :  { %v2077_v40 = vsub.f32 1.5, %v2076_v53 }
0x1193   :  { %v2078_v37 = vmul.f32 %v2350_v34, %v2077_v40 }
0x1195   :  { %v2082_v2 = vsel %vm2081_vm14, %v2350_v34, %v2078_v37 }
0x1196   :  { %v2084_v3 = vmul.f32 %v2082_v2, %v2050_v38 }
0x1198   :  { %v2089_v55 = vmul.f32 %v2255_v57, %v2084_v3 }
0x119a   :  { %v2094_v5 = vadd.f32 %v2256_v58, %v2089_v55 }
0x119c   :  { %v2096_v6 = vsel %vm171_vm2, %v2094_v5, 0.0 }
0x119d   :  { %2098 = vst [vmem:[%s3188_s19 + $0x8] sm:$0xff] %v2096_v6 }

</bundles_post_ra>
